<compile_context>
chip_gen: v7x
topology: tpu7x:2x2x1
jax: 0.10.0
libtpu: 0.0.40
codegen_flags: <defaults>
</compile_context>

<pallas_src>
import functools

import jax
import jax.numpy as jnp
from jax.experimental import pallas as pl
from jax.experimental.pallas import tpu as pltpu

EPS = 1e-5
NEG_INF = -1e30


def _layernorm(x, gamma, beta):
    mu = jnp.mean(x, axis=-1, keepdims=True)
    var = jnp.mean((x - mu) ** 2, axis=-1, keepdims=True)
    return (x - mu) * jax.lax.rsqrt(var + EPS) * gamma + beta


def _bf16(x):
    return x.astype(jnp.bfloat16)


# ---------------------------------------------------------------------------
# Fused transformer kernel: grid = (batch_tiles, num_layers)
# ---------------------------------------------------------------------------
def transformer_kernel(prompts_ref, pos_ref,
                       ln1_g_ref, ln1_b_ref, wqkv_ref, bqkv_ref,
                       wout_ref, bout_ref, ln2_g_ref, ln2_b_ref,
                       wfc_ref, bfc_ref, wproj_ref, bproj_ref,
                       o_ref, x_scr, mask_ref, *, num_heads):
    layer = pl.program_id(1)
    n_layers = pl.num_programs(1)

    Bt, S, D = x_scr.shape
    H = num_heads
    hd = D // H
    T = Bt * S
    scale = 1.0 / float(hd) ** 0.5

    @pl.when(layer == 0)
    def _init():
        # fuse `prompts + positional_embedding`; build the causal mask once.
        x_scr[...] = (prompts_ref[...].astype(jnp.float32)
                      + pos_ref[...][None].astype(jnp.float32))
        row = jax.lax.broadcasted_iota(jnp.int32, (S, S), 0)
        col = jax.lax.broadcasted_iota(jnp.int32, (S, S), 1)
        mask_ref[...] = jnp.where(col <= row, 0.0, NEG_INF).astype(jnp.float32)

    x = x_scr[...].reshape(T, D)                 # f32 residual stream (resident)
    mask = mask_ref[...]

    # ---- self-attention (pre-LN, causal) ----
    h = _layernorm(x, ln1_g_ref[0], ln1_b_ref[0])
    qkv = jnp.dot(_bf16(h), _bf16(wqkv_ref[0]),
                  preferred_element_type=jnp.float32) + bqkv_ref[0]
    wout = wout_ref[0]

    attn = jnp.zeros((T, D), jnp.float32)
    for hh in range(H):                          # static unroll over heads
        q = qkv[:, hh * hd:(hh + 1) * hd].reshape(Bt, S, hd)
        k = qkv[:, D + hh * hd:D + (hh + 1) * hd].reshape(Bt, S, hd)
        v = qkv[:, 2 * D + hh * hd:2 * D + (hh + 1) * hd].reshape(Bt, S, hd)
        s = jnp.einsum('bqd,bkd->bqk', _bf16(q), _bf16(k),
                       preferred_element_type=jnp.float32) * scale
        s = s + mask[None]                       # f32 mask / softmax math
        m = jnp.max(s, axis=-1, keepdims=True)
        p = jnp.exp(s - m)
        p = p * pl.reciprocal(jnp.sum(p, axis=-1, keepdims=True), approx=True)
        o = jnp.einsum('bqk,bkd->bqd', _bf16(p), _bf16(v),
                       preferred_element_type=jnp.float32).reshape(T, hd)
        # accumulate through the matching rows of the output projection
        # (avoids a lane-dim concatenate of head outputs).
        attn = attn + jnp.dot(_bf16(o), _bf16(wout[hh * hd:(hh + 1) * hd, :]),
                              preferred_element_type=jnp.float32)
    x = x + attn + bout_ref[0]

    # ---- MLP (Linear -> QuickGELU -> Linear) ----
    h2 = _layernorm(x, ln2_g_ref[0], ln2_b_ref[0])
    f = jnp.dot(_bf16(h2), _bf16(wfc_ref[0]),
                preferred_element_type=jnp.float32) + bfc_ref[0]
    g = f * jax.nn.sigmoid(1.702 * f)            # QuickGELU
    x = x + jnp.dot(_bf16(g), _bf16(wproj_ref[0]),
                    preferred_element_type=jnp.float32) + bproj_ref[0]

    x_scr[...] = x.reshape(Bt, S, D)

    @pl.when(layer == n_layers - 1)
    def _finalize():
        o_ref[...] = x_scr[...].astype(o_ref.dtype)


# ---------------------------------------------------------------------------
# Final head: LayerNorm + text projection on the gathered EOT rows only
# ---------------------------------------------------------------------------
def eot_head_kernel(x_ref, g_ref, b_ref, w_ref, o_ref):
    h = _layernorm(x_ref[...].astype(jnp.float32), g_ref[...], b_ref[...])
    o_ref[...] = jnp.dot(_bf16(h), _bf16(w_ref[...]),
                         preferred_element_type=jnp.float32).astype(o_ref.dtype)


# ---------------------------------------------------------------------------
# Wrappers (pallas_call plumbing)
# ---------------------------------------------------------------------------
def stack_layer_params(layer_params):
    """List of 12-tuples (one per layer) -> 12 arrays with leading L axis."""
    return tuple(jnp.stack(ps, axis=0) for ps in zip(*layer_params))


def run_transformer(prompts, pos_emb, stacked_params, num_heads):
    B, S, D = prompts.shape
    L = stacked_params[0].shape[0]

    def weight_spec(p):
        n_rest = p.ndim - 1
        return pl.BlockSpec((1,) + tuple(p.shape[1:]),
                            lambda bt, l, _n=n_rest: (l,) + (0,) * _n)

    return pl.pallas_call(
        functools.partial(transformer_kernel, num_heads=num_heads),
        out_shape=jax.ShapeDtypeStruct((B, S, D), jnp.float32),
        grid=(1, L),                               # (batch_tiles, layers)
        in_specs=[pl.BlockSpec((B, S, D), lambda bt, l: (bt, 0, 0)),
                  pl.BlockSpec((S, D), lambda bt, l: (0, 0))]
                 + [weight_spec(p) for p in stacked_params],
        out_specs=pl.BlockSpec((B, S, D), lambda bt, l: (bt, 0, 0)),
        scratch_shapes=[pltpu.VMEM((B, S, D), jnp.float32),   # resident acts
                        pltpu.VMEM((S, S), jnp.float32)],     # causal mask
        compiler_params=pltpu.CompilerParams(
            dimension_semantics=("parallel", "arbitrary")),
    )(prompts, pos_emb, *stacked_params)


def run_eot_head(x_eot, lnf_g, lnf_b, text_projection):
    B = x_eot.shape[0]
    E = text_projection.shape[1]
    return pl.pallas_call(
        eot_head_kernel,
        out_shape=jax.ShapeDtypeStruct((B, E), jnp.float32),
    )(x_eot, lnf_g, lnf_b, text_projection)


def text_encoder_forward(prompts, tokenized_prompts, pos_emb, stacked_params,
                         lnf_g, lnf_b, text_projection, num_heads):
    x = run_transformer(prompts, pos_emb, stacked_params, num_heads)
    # gather the EOT token per sequence (trivial JAX glue), then LN + project
    # only the (B, D) rows -- avoids a full (B, S, D) ln_final pass.
    eot = jnp.argmax(tokenized_prompts, axis=-1)
    x_eot = x[jnp.arange(x.shape[0]), eot]          # (B, D)
    return run_eot_head(x_eot, lnf_g, lnf_b, text_projection)   # (B, E)


# ---------------------------------------------------------------------------
# Pure-JAX reference (mirrors PyTorch semantics) for a correctness check
# ---------------------------------------------------------------------------
def reference_forward(prompts, tokenized_prompts, pos_emb, layer_params,
                      lnf_g, lnf_b, text_projection, num_heads):
    x = prompts + pos_emb
    B, S, D = x.shape
    hd = D // num_heads
    row = jnp.arange(S)[:, None]
    col = jnp.arange(S)[None, :]
    causal = jnp.where(col <= row, 0.0, -1e30)
    for (ln1_g, ln1_b, wqkv, bqkv, wout, bout,
         ln2_g, ln2_b, wfc, bfc, wproj, bproj) in layer_params:
        h = _layernorm(x, ln1_g, ln1_b)
        qkv = h @ wqkv + bqkv
        q, k, v = jnp.split(qkv, 3, axis=-1)
        qh = q.reshape(B, S, num_heads, hd).transpose(0, 2, 1, 3)
        kh = k.reshape(B, S, num_heads, hd).transpose(0, 2, 1, 3)
        vh = v.reshape(B, S, num_heads, hd).transpose(0, 2, 1, 3)
        s = jnp.einsum('bhqd,bhkd->bhqk', qh, kh) / (hd ** 0.5) + causal
        p = jax.nn.softmax(s, axis=-1)
        o = jnp.einsum('bhqk,bhkd->bhqd', p, vh).transpose(0, 2, 1, 3).reshape(B, S, D)
        x = x + o @ wout + bout
        h2 = _layernorm(x, ln2_g, ln2_b)
        f = h2 @ wfc + bfc
        x = x + (f * jax.nn.sigmoid(1.702 * f)) @ wproj + bproj
    x = _layernorm(x, lnf_g, lnf_b)
    eot = jnp.argmax(tokenized_prompts, axis=-1)
    return x[jnp.arange(B), eot] @ text_projection


# ---------------------------------------------------------------------------
if __name__ == "__main__":
    B, S, D = 2, 8, 32          # batch, seq (context length), width
    NUM_HEADS, NUM_LAYERS, EMBED = 4, 2, 16

    key = jax.random.PRNGKey(0)

    def nrm(k, shape, scale=0.02):
        return (scale * jax.random.normal(k, shape)).astype(jnp.float32)

    key, kp, kpe, ktok = jax.random.split(key, 4)
    prompts = nrm(kp, (B, S, D), scale=1.0)
    pos_emb = nrm(kpe, (S, D))
    tokenized_prompts = jax.random.randint(ktok, (B, S), 1, 1000).astype(jnp.int32)
    # plant EOT-like (max-id) tokens at distinct positions
    tokenized_prompts = tokenized_prompts.at[0, 5].set(49407)
    tokenized_prompts = tokenized_prompts.at[1, 3].set(49407)

    layer_params = []
    for _ in range(NUM_LAYERS):
        key, *ks = jax.random.split(key, 13)
        ln1_g = jnp.ones((1, D), jnp.float32) + nrm(ks[0], (1, D))
        ln1_b = nrm(ks[1], (1, D))
        wqkv = nrm(ks[2], (D, 3 * D))
        bqkv = nrm(ks[3], (1, 3 * D))
        wout = nrm(ks[4], (D, D))
        bout = nrm(ks[5], (1, D))
        ln2_g = jnp.ones((1, D), jnp.float32) + nrm(ks[6], (1, D))
        ln2_b = nrm(ks[7], (1, D))
        wfc = nrm(ks[8], (D, 4 * D))
        bfc = nrm(ks[9], (1, 4 * D))
        wproj = nrm(ks[10], (4 * D, D))
        bproj = nrm(ks[11], (1, D))
        layer_params.append((ln1_g, ln1_b, wqkv, bqkv, wout, bout,
                             ln2_g, ln2_b, wfc, bfc, wproj, bproj))

    key, kg, kb, ktp = jax.random.split(key, 4)
    lnf_g = jnp.ones((1, D), jnp.float32) + nrm(kg, (1, D))
    lnf_b = nrm(kb, (1, D))
    text_projection = nrm(ktp, (D, EMBED))

    stacked_params = stack_layer_params(layer_params)

    out = text_encoder_forward(prompts, tokenized_prompts, pos_emb,
                               stacked_params, lnf_g, lnf_b,
                               text_projection, NUM_HEADS)
    out = jax.block_until_ready(out)

    ref = reference_forward(prompts, tokenized_prompts, pos_emb, layer_params,
                            lnf_g, lnf_b, text_projection, NUM_HEADS)
    assert out.shape == (B, EMBED)
    assert jnp.allclose(out, ref, atol=2e-2, rtol=2e-2), "mismatch vs reference"

    print("KERNEL_OK")
</pallas_src>

<mosaic_0001>
module attributes {stable_mosaic.version = 11 : i64} {
  func.func @transformer_kernel(%arg0: i32, %arg1: i32, %arg2: memref<2x8x32xf32, #tpu.memory_space<vmem>>, %arg3: memref<8x32xf32, #tpu.memory_space<vmem>>, %arg4: memref<1x1x32xf32, #tpu.memory_space<vmem>>, %arg5: memref<1x1x32xf32, #tpu.memory_space<vmem>>, %arg6: memref<1x32x96xf32, #tpu.memory_space<vmem>>, %arg7: memref<1x1x96xf32, #tpu.memory_space<vmem>>, %arg8: memref<1x32x32xf32, #tpu.memory_space<vmem>>, %arg9: memref<1x1x32xf32, #tpu.memory_space<vmem>>, %arg10: memref<1x1x32xf32, #tpu.memory_space<vmem>>, %arg11: memref<1x1x32xf32, #tpu.memory_space<vmem>>, %arg12: memref<1x32x128xf32, #tpu.memory_space<vmem>>, %arg13: memref<1x1x128xf32, #tpu.memory_space<vmem>>, %arg14: memref<1x128x32xf32, #tpu.memory_space<vmem>>, %arg15: memref<1x1x32xf32, #tpu.memory_space<vmem>>, %arg16: memref<2x8x32xf32, #tpu.memory_space<vmem>>, %arg17: memref<2x8x32xf32, #tpu.memory_space<vmem>>, %arg18: memref<8x8xf32, #tpu.memory_space<vmem>>) attributes {dimension_semantics = [#tpu.dimension_semantics<parallel>, #tpu.dimension_semantics<arbitrary>], iteration_bounds = array<i64: 1, 2>, scalar_prefetch = 0 : i64, scratch_operands = 2 : i64, tpu.core_type = #tpu.core_type<tc>, window_params = [{transform_indices = @transform_0, window_bounds = array<i64: 2, 8, 32>}, {pipeline_mode = #tpu.pipeline_mode<synchronous>, transform_indices = @transform_1, window_bounds = array<i64: 8, 32>}, {transform_indices = @transform_2, window_bounds = array<i64: 1, 1, 32>}, {transform_indices = @transform_3, window_bounds = array<i64: 1, 1, 32>}, {transform_indices = @transform_4, window_bounds = array<i64: 1, 32, 96>}, {transform_indices = @transform_5, window_bounds = array<i64: 1, 1, 96>}, {transform_indices = @transform_6, window_bounds = array<i64: 1, 32, 32>}, {transform_indices = @transform_7, window_bounds = array<i64: 1, 1, 32>}, {transform_indices = @transform_8, window_bounds = array<i64: 1, 1, 32>}, {transform_indices = @transform_9, window_bounds = array<i64: 1, 1, 32>}, {transform_indices = @transform_10, window_bounds = array<i64: 1, 32, 128>}, {transform_indices = @transform_11, window_bounds = array<i64: 1, 1, 128>}, {transform_indices = @transform_12, window_bounds = array<i64: 1, 128, 32>}, {transform_indices = @transform_13, window_bounds = array<i64: 1, 1, 32>}, {transform_indices = @transform_14, window_bounds = array<i64: 2, 8, 32>}]} {
    %c0_i32 = arith.constant 0 : i32
    %0 = arith.cmpi eq, %arg1, %c0_i32 : i32
    %1 = arith.extui %0 : i1 to i32
    %c0_i32_0 = arith.constant 0 : i32
    %2 = arith.cmpi ne, %1, %c0_i32_0 : i32
    scf.if %2 {
      %c0_84 = arith.constant 0 : index
      %c0_85 = arith.constant 0 : index
      %c0_86 = arith.constant 0 : index
      %239 = vector.load %arg2[%c0_84, %c0_85, %c0_86] : memref<2x8x32xf32, #tpu.memory_space<vmem>>, vector<2x8x32xf32>
      %c0_87 = arith.constant 0 : index
      %c0_88 = arith.constant 0 : index
      %240 = vector.load %arg3[%c0_87, %c0_88] : memref<8x32xf32, #tpu.memory_space<vmem>>, vector<8x32xf32>
      %241 = vector.shape_cast %240 : vector<8x32xf32> to vector<1x8x32xf32>
      %242 = vector.broadcast %241 : vector<1x8x32xf32> to vector<2x8x32xf32>
      %243 = arith.addf %239, %242 : vector<2x8x32xf32>
      %c0_89 = arith.constant 0 : index
      %c0_90 = arith.constant 0 : index
      %c0_91 = arith.constant 0 : index
      %244 = vector.load %arg17[%c0_89, %c0_90, %c0_91] : memref<2x8x32xf32, #tpu.memory_space<vmem>>, vector<2x8x32xf32>
      tpu.vector_store %arg17[%c0_89, %c0_90, %c0_91], %243 {strides = array<i32>} : memref<2x8x32xf32, #tpu.memory_space<vmem>>, vector<2x8x32xf32>,
      %245 = tpu.iota {dimensions = array<i32: 0>} : vector<8x8xi32>
      %246 = tpu.iota {dimensions = array<i32: 1>} : vector<8x8xi32>
      %247 = arith.cmpi sle, %246, %245 : vector<8x8xi32>
      %cst_92 = arith.constant 0.000000e+00 : f32
      %cst_93 = arith.constant -1.000000e+30 : f32
      %248 = vector.broadcast %cst_92 : f32 to vector<8x8xf32>
      %249 = vector.broadcast %cst_93 : f32 to vector<8x8xf32>
      %250 = arith.select %247, %248, %249 : vector<8x8xi1>, vector<8x8xf32>
      %c0_94 = arith.constant 0 : index
      %c0_95 = arith.constant 0 : index
      %251 = vector.load %arg18[%c0_94, %c0_95] : memref<8x8xf32, #tpu.memory_space<vmem>>, vector<8x8xf32>
      tpu.vector_store %arg18[%c0_94, %c0_95], %250 {strides = array<i32>} : memref<8x8xf32, #tpu.memory_space<vmem>>, vector<8x8xf32>,
    } else {
    }
    %c0 = arith.constant 0 : index
    %c0_1 = arith.constant 0 : index
    %c0_2 = arith.constant 0 : index
    %3 = vector.load %arg17[%c0, %c0_1, %c0_2] : memref<2x8x32xf32, #tpu.memory_space<vmem>>, vector<2x8x32xf32>
    %4 = vector.shape_cast %3 : vector<2x8x32xf32> to vector<16x32xf32>
    %c0_3 = arith.constant 0 : index
    %c0_4 = arith.constant 0 : index
    %5 = vector.load %arg18[%c0_3, %c0_4] : memref<8x8xf32, #tpu.memory_space<vmem>>, vector<8x8xf32>
    %c0_5 = arith.constant 0 : index
    %c0_6 = arith.constant 0 : index
    %c0_7 = arith.constant 0 : index
    %6 = vector.load %arg4[%c0_5, %c0_6, %c0_7] : memref<1x1x32xf32, #tpu.memory_space<vmem>>, vector<1x1x32xf32>
    %7 = vector.shape_cast %6 : vector<1x1x32xf32> to vector<1x32xf32>
    %c0_8 = arith.constant 0 : index
    %c0_9 = arith.constant 0 : index
    %c0_10 = arith.constant 0 : index
    %8 = vector.load %arg5[%c0_8, %c0_9, %c0_10] : memref<1x1x32xf32, #tpu.memory_space<vmem>>, vector<1x1x32xf32>
    %9 = vector.shape_cast %8 : vector<1x1x32xf32> to vector<1x32xf32>
    %cst = arith.constant dense<0.000000e+00> : vector<16xf32>
    %10 = vector.multi_reduction <add>, %4, %cst [1] : vector<16x32xf32> to vector<16xf32>
    %11 = vector.shape_cast %10 : vector<16xf32> to vector<16x1xf32>
    %cst_11 = arith.constant 3.200000e+01 : f32
    %12 = vector.broadcast %cst_11 : f32 to vector<16x1xf32>
    %13 = arith.divf %11, %12 : vector<16x1xf32>
    %14 = vector.broadcast %13 : vector<16x1xf32> to vector<16x32xf32>
    %15 = arith.subf %4, %14 : vector<16x32xf32>
    %16 = arith.mulf %15, %15 : vector<16x32xf32>
    %cst_12 = arith.constant dense<0.000000e+00> : vector<16xf32>
    %17 = vector.multi_reduction <add>, %16, %cst_12 [1] : vector<16x32xf32> to vector<16xf32>
    %18 = vector.shape_cast %17 : vector<16xf32> to vector<16x1xf32>
    %cst_13 = arith.constant 3.200000e+01 : f32
    %19 = vector.broadcast %cst_13 : f32 to vector<16x1xf32>
    %20 = arith.divf %18, %19 : vector<16x1xf32>
    %21 = vector.broadcast %13 : vector<16x1xf32> to vector<16x32xf32>
    %22 = arith.subf %4, %21 : vector<16x32xf32>
    %cst_14 = arith.constant 9.99999974E-6 : f32
    %23 = vector.broadcast %cst_14 : f32 to vector<16x1xf32>
    %24 = arith.addf %20, %23 : vector<16x1xf32>
    %25 = math.rsqrt %24 : vector<16x1xf32>
    %26 = vector.broadcast %25 : vector<16x1xf32> to vector<16x32xf32>
    %27 = arith.mulf %22, %26 : vector<16x32xf32>
    %28 = vector.broadcast %7 : vector<1x32xf32> to vector<16x32xf32>
    %29 = arith.mulf %27, %28 : vector<16x32xf32>
    %30 = vector.broadcast %9 : vector<1x32xf32> to vector<16x32xf32>
    %31 = arith.addf %29, %30 : vector<16x32xf32>
    %32 = arith.truncf %31 : vector<16x32xf32> to vector<16x32xbf16>
    %c0_15 = arith.constant 0 : index
    %c0_16 = arith.constant 0 : index
    %c0_17 = arith.constant 0 : index
    %33 = vector.load %arg6[%c0_15, %c0_16, %c0_17] : memref<1x32x96xf32, #tpu.memory_space<vmem>>, vector<1x32x96xf32>
    %34 = vector.shape_cast %33 : vector<1x32x96xf32> to vector<32x96xf32>
    %35 = arith.truncf %34 : vector<32x96xf32> to vector<32x96xbf16>
    %cst_18 = arith.constant dense<0.000000e+00> : vector<16x96xf32>
    %36 = tpu.matmul %32, %35, %cst_18 {dimension_numbers = #tpu.dot_dimension_numbers<[1], [0], [0], [1], [0, 0, 1, 1], [], []>} : vector<16x32xbf16>, vector<32x96xbf16>, vector<16x96xf32> -> vector<16x96xf32>
    %c0_19 = arith.constant 0 : index
    %c0_20 = arith.constant 0 : index
    %c0_21 = arith.constant 0 : index
    %37 = vector.load %arg7[%c0_19, %c0_20, %c0_21] : memref<1x1x96xf32, #tpu.memory_space<vmem>>, vector<1x1x96xf32>
    %38 = vector.shape_cast %37 : vector<1x1x96xf32> to vector<1x96xf32>
    %39 = vector.broadcast %38 : vector<1x96xf32> to vector<16x96xf32>
    %40 = arith.addf %36, %39 : vector<16x96xf32>
    %c0_22 = arith.constant 0 : index
    %c0_23 = arith.constant 0 : index
    %c0_24 = arith.constant 0 : index
    %41 = vector.load %arg8[%c0_22, %c0_23, %c0_24] : memref<1x32x32xf32, #tpu.memory_space<vmem>>, vector<1x32x32xf32>
    %42 = vector.shape_cast %41 : vector<1x32x32xf32> to vector<32x32xf32>
    %cst_25 = arith.constant 0.000000e+00 : f32
    %43 = vector.broadcast %cst_25 : f32 to vector<16x32xf32>
    %44 = vector.extract_strided_slice %40 {offsets = [0, 0], sizes = [16, 8], strides = [1, 1]} : vector<16x96xf32> to vector<16x8xf32>
    %45 = vector.shape_cast %44 : vector<16x8xf32> to vector<2x8x8xf32>
    %46 = vector.extract_strided_slice %40 {offsets = [0, 32], sizes = [16, 8], strides = [1, 1]} : vector<16x96xf32> to vector<16x8xf32>
    %47 = vector.shape_cast %46 : vector<16x8xf32> to vector<2x8x8xf32>
    %48 = vector.extract_strided_slice %40 {offsets = [0, 64], sizes = [16, 8], strides = [1, 1]} : vector<16x96xf32> to vector<16x8xf32>
    %49 = vector.shape_cast %48 : vector<16x8xf32> to vector<2x8x8xf32>
    %50 = arith.truncf %45 : vector<2x8x8xf32> to vector<2x8x8xbf16>
    %51 = arith.truncf %47 : vector<2x8x8xf32> to vector<2x8x8xbf16>
    "tpu.trace_start"() <{level = 10 : i32, message = "bqd,bkd->bqk"}> : () -> ()
    %cst_26 = arith.constant dense<0.000000e+00> : vector<2x8x8xf32>
    %52 = tpu.matmul %50, %51, %cst_26 {dimension_numbers = #tpu.dot_dimension_numbers<[2], [2], [1], [1], [0, 0, 0, 1, 1, 1], [0], [0]>} : vector<2x8x8xbf16>, vector<2x8x8xbf16>, vector<2x8x8xf32> -> vector<2x8x8xf32>
    "tpu.trace_stop"() : () -> ()
    %cst_27 = arith.constant 0.353553385 : f32
    %53 = vector.broadcast %cst_27 : f32 to vector<2x8x8xf32>
    %54 = arith.mulf %52, %53 : vector<2x8x8xf32>
    %55 = vector.shape_cast %5 : vector<8x8xf32> to vector<1x8x8xf32>
    %56 = vector.broadcast %55 : vector<1x8x8xf32> to vector<2x8x8xf32>
    %57 = arith.addf %54, %56 : vector<2x8x8xf32>
    %cst_28 = arith.constant dense<0xFF800000> : vector<2x8xf32>
    %58 = vector.multi_reduction <maximumf>, %57, %cst_28 [2] : vector<2x8x8xf32> to vector<2x8xf32>
    %59 = vector.shape_cast %58 : vector<2x8xf32> to vector<2x8x1xf32>
    %60 = vector.broadcast %59 : vector<2x8x1xf32> to vector<2x8x8xf32>
    %61 = arith.subf %57, %60 : vector<2x8x8xf32>
    %62 = math.exp %61 : vector<2x8x8xf32>
    %cst_29 = arith.constant dense<0.000000e+00> : vector<2x8xf32>
    %63 = vector.multi_reduction <add>, %62, %cst_29 [2] : vector<2x8x8xf32> to vector<2x8xf32>
    %64 = vector.shape_cast %63 : vector<2x8xf32> to vector<2x8x1xf32>
    %65 = tpu.reciprocal %64 {approx = true} : vector<2x8x1xf32> -> vector<2x8x1xf32>
    %66 = vector.broadcast %65 : vector<2x8x1xf32> to vector<2x8x8xf32>
    %67 = arith.mulf %62, %66 : vector<2x8x8xf32>
    %68 = arith.truncf %67 : vector<2x8x8xf32> to vector<2x8x8xbf16>
    %69 = arith.truncf %49 : vector<2x8x8xf32> to vector<2x8x8xbf16>
    "tpu.trace_start"() <{level = 10 : i32, message = "bqk,bkd->bqd"}> : () -> ()
    %cst_30 = arith.constant dense<0.000000e+00> : vector<2x8x8xf32>
    %70 = tpu.matmul %68, %69, %cst_30 {dimension_numbers = #tpu.dot_dimension_numbers<[2], [1], [1], [2], [0, 0, 0, 1, 1, 2], [0], [0]>} : vector<2x8x8xbf16>, vector<2x8x8xbf16>, vector<2x8x8xf32> -> vector<2x8x8xf32>
    "tpu.trace_stop"() : () -> ()
    %71 = vector.shape_cast %70 : vector<2x8x8xf32> to vector<16x8xf32>
    %72 = arith.truncf %71 : vector<16x8xf32> to vector<16x8xbf16>
    %73 = vector.extract_strided_slice %42 {offsets = [0, 0], sizes = [8, 32], strides = [1, 1]} : vector<32x32xf32> to vector<8x32xf32>
    %74 = arith.truncf %73 : vector<8x32xf32> to vector<8x32xbf16>
    %cst_31 = arith.constant dense<0.000000e+00> : vector<16x32xf32>
    %75 = tpu.matmul %72, %74, %cst_31 {dimension_numbers = #tpu.dot_dimension_numbers<[1], [0], [0], [1], [0, 0, 1, 1], [], []>} : vector<16x8xbf16>, vector<8x32xbf16>, vector<16x32xf32> -> vector<16x32xf32>
    %76 = arith.addf %43, %75 : vector<16x32xf32>
    %77 = vector.extract_strided_slice %40 {offsets = [0, 8], sizes = [16, 8], strides = [1, 1]} : vector<16x96xf32> to vector<16x8xf32>
    %78 = vector.shape_cast %77 : vector<16x8xf32> to vector<2x8x8xf32>
    %79 = vector.extract_strided_slice %40 {offsets = [0, 40], sizes = [16, 8], strides = [1, 1]} : vector<16x96xf32> to vector<16x8xf32>
    %80 = vector.shape_cast %79 : vector<16x8xf32> to vector<2x8x8xf32>
    %81 = vector.extract_strided_slice %40 {offsets = [0, 72], sizes = [16, 8], strides = [1, 1]} : vector<16x96xf32> to vector<16x8xf32>
    %82 = vector.shape_cast %81 : vector<16x8xf32> to vector<2x8x8xf32>
    %83 = arith.truncf %78 : vector<2x8x8xf32> to vector<2x8x8xbf16>
    %84 = arith.truncf %80 : vector<2x8x8xf32> to vector<2x8x8xbf16>
    "tpu.trace_start"() <{level = 10 : i32, message = "bqd,bkd->bqk"}> : () -> ()
    %cst_32 = arith.constant dense<0.000000e+00> : vector<2x8x8xf32>
    %85 = tpu.matmul %83, %84, %cst_32 {dimension_numbers = #tpu.dot_dimension_numbers<[2], [2], [1], [1], [0, 0, 0, 1, 1, 1], [0], [0]>} : vector<2x8x8xbf16>, vector<2x8x8xbf16>, vector<2x8x8xf32> -> vector<2x8x8xf32>
    "tpu.trace_stop"() : () -> ()
    %cst_33 = arith.constant 0.353553385 : f32
    %86 = vector.broadcast %cst_33 : f32 to vector<2x8x8xf32>
    %87 = arith.mulf %85, %86 : vector<2x8x8xf32>
    %88 = vector.shape_cast %5 : vector<8x8xf32> to vector<1x8x8xf32>
    %89 = vector.broadcast %88 : vector<1x8x8xf32> to vector<2x8x8xf32>
    %90 = arith.addf %87, %89 : vector<2x8x8xf32>
    %cst_34 = arith.constant dense<0xFF800000> : vector<2x8xf32>
    %91 = vector.multi_reduction <maximumf>, %90, %cst_34 [2] : vector<2x8x8xf32> to vector<2x8xf32>
    %92 = vector.shape_cast %91 : vector<2x8xf32> to vector<2x8x1xf32>
    %93 = vector.broadcast %92 : vector<2x8x1xf32> to vector<2x8x8xf32>
    %94 = arith.subf %90, %93 : vector<2x8x8xf32>
    %95 = math.exp %94 : vector<2x8x8xf32>
    %cst_35 = arith.constant dense<0.000000e+00> : vector<2x8xf32>
    %96 = vector.multi_reduction <add>, %95, %cst_35 [2] : vector<2x8x8xf32> to vector<2x8xf32>
    %97 = vector.shape_cast %96 : vector<2x8xf32> to vector<2x8x1xf32>
    %98 = tpu.reciprocal %97 {approx = true} : vector<2x8x1xf32> -> vector<2x8x1xf32>
    %99 = vector.broadcast %98 : vector<2x8x1xf32> to vector<2x8x8xf32>
    %100 = arith.mulf %95, %99 : vector<2x8x8xf32>
    %101 = arith.truncf %100 : vector<2x8x8xf32> to vector<2x8x8xbf16>
    %102 = arith.truncf %82 : vector<2x8x8xf32> to vector<2x8x8xbf16>
    "tpu.trace_start"() <{level = 10 : i32, message = "bqk,bkd->bqd"}> : () -> ()
    %cst_36 = arith.constant dense<0.000000e+00> : vector<2x8x8xf32>
    %103 = tpu.matmul %101, %102, %cst_36 {dimension_numbers = #tpu.dot_dimension_numbers<[2], [1], [1], [2], [0, 0, 0, 1, 1, 2], [0], [0]>} : vector<2x8x8xbf16>, vector<2x8x8xbf16>, vector<2x8x8xf32> -> vector<2x8x8xf32>
    "tpu.trace_stop"() : () -> ()
    %104 = vector.shape_cast %103 : vector<2x8x8xf32> to vector<16x8xf32>
    %105 = arith.truncf %104 : vector<16x8xf32> to vector<16x8xbf16>
    %106 = vector.extract_strided_slice %42 {offsets = [8, 0], sizes = [8, 32], strides = [1, 1]} : vector<32x32xf32> to vector<8x32xf32>
    %107 = arith.truncf %106 : vector<8x32xf32> to vector<8x32xbf16>
    %cst_37 = arith.constant dense<0.000000e+00> : vector<16x32xf32>
    %108 = tpu.matmul %105, %107, %cst_37 {dimension_numbers = #tpu.dot_dimension_numbers<[1], [0], [0], [1], [0, 0, 1, 1], [], []>} : vector<16x8xbf16>, vector<8x32xbf16>, vector<16x32xf32> -> vector<16x32xf32>
    %109 = arith.addf %76, %108 : vector<16x32xf32>
    %110 = vector.extract_strided_slice %40 {offsets = [0, 16], sizes = [16, 8], strides = [1, 1]} : vector<16x96xf32> to vector<16x8xf32>
    %111 = vector.shape_cast %110 : vector<16x8xf32> to vector<2x8x8xf32>
    %112 = vector.extract_strided_slice %40 {offsets = [0, 48], sizes = [16, 8], strides = [1, 1]} : vector<16x96xf32> to vector<16x8xf32>
    %113 = vector.shape_cast %112 : vector<16x8xf32> to vector<2x8x8xf32>
    %114 = vector.extract_strided_slice %40 {offsets = [0, 80], sizes = [16, 8], strides = [1, 1]} : vector<16x96xf32> to vector<16x8xf32>
    %115 = vector.shape_cast %114 : vector<16x8xf32> to vector<2x8x8xf32>
    %116 = arith.truncf %111 : vector<2x8x8xf32> to vector<2x8x8xbf16>
    %117 = arith.truncf %113 : vector<2x8x8xf32> to vector<2x8x8xbf16>
    "tpu.trace_start"() <{level = 10 : i32, message = "bqd,bkd->bqk"}> : () -> ()
    %cst_38 = arith.constant dense<0.000000e+00> : vector<2x8x8xf32>
    %118 = tpu.matmul %116, %117, %cst_38 {dimension_numbers = #tpu.dot_dimension_numbers<[2], [2], [1], [1], [0, 0, 0, 1, 1, 1], [0], [0]>} : vector<2x8x8xbf16>, vector<2x8x8xbf16>, vector<2x8x8xf32> -> vector<2x8x8xf32>
    "tpu.trace_stop"() : () -> ()
    %cst_39 = arith.constant 0.353553385 : f32
    %119 = vector.broadcast %cst_39 : f32 to vector<2x8x8xf32>
    %120 = arith.mulf %118, %119 : vector<2x8x8xf32>
    %121 = vector.shape_cast %5 : vector<8x8xf32> to vector<1x8x8xf32>
    %122 = vector.broadcast %121 : vector<1x8x8xf32> to vector<2x8x8xf32>
    %123 = arith.addf %120, %122 : vector<2x8x8xf32>
    %cst_40 = arith.constant dense<0xFF800000> : vector<2x8xf32>
    %124 = vector.multi_reduction <maximumf>, %123, %cst_40 [2] : vector<2x8x8xf32> to vector<2x8xf32>
    %125 = vector.shape_cast %124 : vector<2x8xf32> to vector<2x8x1xf32>
    %126 = vector.broadcast %125 : vector<2x8x1xf32> to vector<2x8x8xf32>
    %127 = arith.subf %123, %126 : vector<2x8x8xf32>
    %128 = math.exp %127 : vector<2x8x8xf32>
    %cst_41 = arith.constant dense<0.000000e+00> : vector<2x8xf32>
    %129 = vector.multi_reduction <add>, %128, %cst_41 [2] : vector<2x8x8xf32> to vector<2x8xf32>
    %130 = vector.shape_cast %129 : vector<2x8xf32> to vector<2x8x1xf32>
    %131 = tpu.reciprocal %130 {approx = true} : vector<2x8x1xf32> -> vector<2x8x1xf32>
    %132 = vector.broadcast %131 : vector<2x8x1xf32> to vector<2x8x8xf32>
    %133 = arith.mulf %128, %132 : vector<2x8x8xf32>
    %134 = arith.truncf %133 : vector<2x8x8xf32> to vector<2x8x8xbf16>
    %135 = arith.truncf %115 : vector<2x8x8xf32> to vector<2x8x8xbf16>
    "tpu.trace_start"() <{level = 10 : i32, message = "bqk,bkd->bqd"}> : () -> ()
    %cst_42 = arith.constant dense<0.000000e+00> : vector<2x8x8xf32>
    %136 = tpu.matmul %134, %135, %cst_42 {dimension_numbers = #tpu.dot_dimension_numbers<[2], [1], [1], [2], [0, 0, 0, 1, 1, 2], [0], [0]>} : vector<2x8x8xbf16>, vector<2x8x8xbf16>, vector<2x8x8xf32> -> vector<2x8x8xf32>
    "tpu.trace_stop"() : () -> ()
    %137 = vector.shape_cast %136 : vector<2x8x8xf32> to vector<16x8xf32>
    %138 = arith.truncf %137 : vector<16x8xf32> to vector<16x8xbf16>
    %139 = vector.extract_strided_slice %42 {offsets = [16, 0], sizes = [8, 32], strides = [1, 1]} : vector<32x32xf32> to vector<8x32xf32>
    %140 = arith.truncf %139 : vector<8x32xf32> to vector<8x32xbf16>
    %cst_43 = arith.constant dense<0.000000e+00> : vector<16x32xf32>
    %141 = tpu.matmul %138, %140, %cst_43 {dimension_numbers = #tpu.dot_dimension_numbers<[1], [0], [0], [1], [0, 0, 1, 1], [], []>} : vector<16x8xbf16>, vector<8x32xbf16>, vector<16x32xf32> -> vector<16x32xf32>
    %142 = arith.addf %109, %141 : vector<16x32xf32>
    %143 = vector.extract_strided_slice %40 {offsets = [0, 24], sizes = [16, 8], strides = [1, 1]} : vector<16x96xf32> to vector<16x8xf32>
    %144 = vector.shape_cast %143 : vector<16x8xf32> to vector<2x8x8xf32>
    %145 = vector.extract_strided_slice %40 {offsets = [0, 56], sizes = [16, 8], strides = [1, 1]} : vector<16x96xf32> to vector<16x8xf32>
    %146 = vector.shape_cast %145 : vector<16x8xf32> to vector<2x8x8xf32>
    %147 = vector.extract_strided_slice %40 {offsets = [0, 88], sizes = [16, 8], strides = [1, 1]} : vector<16x96xf32> to vector<16x8xf32>
    %148 = vector.shape_cast %147 : vector<16x8xf32> to vector<2x8x8xf32>
    %149 = arith.truncf %144 : vector<2x8x8xf32> to vector<2x8x8xbf16>
    %150 = arith.truncf %146 : vector<2x8x8xf32> to vector<2x8x8xbf16>
    "tpu.trace_start"() <{level = 10 : i32, message = "bqd,bkd->bqk"}> : () -> ()
    %cst_44 = arith.constant dense<0.000000e+00> : vector<2x8x8xf32>
    %151 = tpu.matmul %149, %150, %cst_44 {dimension_numbers = #tpu.dot_dimension_numbers<[2], [2], [1], [1], [0, 0, 0, 1, 1, 1], [0], [0]>} : vector<2x8x8xbf16>, vector<2x8x8xbf16>, vector<2x8x8xf32> -> vector<2x8x8xf32>
    "tpu.trace_stop"() : () -> ()
    %cst_45 = arith.constant 0.353553385 : f32
    %152 = vector.broadcast %cst_45 : f32 to vector<2x8x8xf32>
    %153 = arith.mulf %151, %152 : vector<2x8x8xf32>
    %154 = vector.shape_cast %5 : vector<8x8xf32> to vector<1x8x8xf32>
    %155 = vector.broadcast %154 : vector<1x8x8xf32> to vector<2x8x8xf32>
    %156 = arith.addf %153, %155 : vector<2x8x8xf32>
    %cst_46 = arith.constant dense<0xFF800000> : vector<2x8xf32>
    %157 = vector.multi_reduction <maximumf>, %156, %cst_46 [2] : vector<2x8x8xf32> to vector<2x8xf32>
    %158 = vector.shape_cast %157 : vector<2x8xf32> to vector<2x8x1xf32>
    %159 = vector.broadcast %158 : vector<2x8x1xf32> to vector<2x8x8xf32>
    %160 = arith.subf %156, %159 : vector<2x8x8xf32>
    %161 = math.exp %160 : vector<2x8x8xf32>
    %cst_47 = arith.constant dense<0.000000e+00> : vector<2x8xf32>
    %162 = vector.multi_reduction <add>, %161, %cst_47 [2] : vector<2x8x8xf32> to vector<2x8xf32>
    %163 = vector.shape_cast %162 : vector<2x8xf32> to vector<2x8x1xf32>
    %164 = tpu.reciprocal %163 {approx = true} : vector<2x8x1xf32> -> vector<2x8x1xf32>
    %165 = vector.broadcast %164 : vector<2x8x1xf32> to vector<2x8x8xf32>
    %166 = arith.mulf %161, %165 : vector<2x8x8xf32>
    %167 = arith.truncf %166 : vector<2x8x8xf32> to vector<2x8x8xbf16>
    %168 = arith.truncf %148 : vector<2x8x8xf32> to vector<2x8x8xbf16>
    "tpu.trace_start"() <{level = 10 : i32, message = "bqk,bkd->bqd"}> : () -> ()
    %cst_48 = arith.constant dense<0.000000e+00> : vector<2x8x8xf32>
    %169 = tpu.matmul %167, %168, %cst_48 {dimension_numbers = #tpu.dot_dimension_numbers<[2], [1], [1], [2], [0, 0, 0, 1, 1, 2], [0], [0]>} : vector<2x8x8xbf16>, vector<2x8x8xbf16>, vector<2x8x8xf32> -> vector<2x8x8xf32>
    "tpu.trace_stop"() : () -> ()
    %170 = vector.shape_cast %169 : vector<2x8x8xf32> to vector<16x8xf32>
    %171 = arith.truncf %170 : vector<16x8xf32> to vector<16x8xbf16>
    %172 = vector.extract_strided_slice %42 {offsets = [24, 0], sizes = [8, 32], strides = [1, 1]} : vector<32x32xf32> to vector<8x32xf32>
    %173 = arith.truncf %172 : vector<8x32xf32> to vector<8x32xbf16>
    %cst_49 = arith.constant dense<0.000000e+00> : vector<16x32xf32>
    %174 = tpu.matmul %171, %173, %cst_49 {dimension_numbers = #tpu.dot_dimension_numbers<[1], [0], [0], [1], [0, 0, 1, 1], [], []>} : vector<16x8xbf16>, vector<8x32xbf16>, vector<16x32xf32> -> vector<16x32xf32>
    %175 = arith.addf %142, %174 : vector<16x32xf32>
    %176 = arith.addf %4, %175 : vector<16x32xf32>
    %c0_50 = arith.constant 0 : index
    %c0_51 = arith.constant 0 : index
    %c0_52 = arith.constant 0 : index
    %177 = vector.load %arg9[%c0_50, %c0_51, %c0_52] : memref<1x1x32xf32, #tpu.memory_space<vmem>>, vector<1x1x32xf32>
    %178 = vector.shape_cast %177 : vector<1x1x32xf32> to vector<1x32xf32>
    %179 = vector.broadcast %178 : vector<1x32xf32> to vector<16x32xf32>
    %180 = arith.addf %176, %179 : vector<16x32xf32>
    %c0_53 = arith.constant 0 : index
    %c0_54 = arith.constant 0 : index
    %c0_55 = arith.constant 0 : index
    %181 = vector.load %arg10[%c0_53, %c0_54, %c0_55] : memref<1x1x32xf32, #tpu.memory_space<vmem>>, vector<1x1x32xf32>
    %182 = vector.shape_cast %181 : vector<1x1x32xf32> to vector<1x32xf32>
    %c0_56 = arith.constant 0 : index
    %c0_57 = arith.constant 0 : index
    %c0_58 = arith.constant 0 : index
    %183 = vector.load %arg11[%c0_56, %c0_57, %c0_58] : memref<1x1x32xf32, #tpu.memory_space<vmem>>, vector<1x1x32xf32>
    %184 = vector.shape_cast %183 : vector<1x1x32xf32> to vector<1x32xf32>
    %cst_59 = arith.constant dense<0.000000e+00> : vector<16xf32>
    %185 = vector.multi_reduction <add>, %180, %cst_59 [1] : vector<16x32xf32> to vector<16xf32>
    %186 = vector.shape_cast %185 : vector<16xf32> to vector<16x1xf32>
    %cst_60 = arith.constant 3.200000e+01 : f32
    %187 = vector.broadcast %cst_60 : f32 to vector<16x1xf32>
    %188 = arith.divf %186, %187 : vector<16x1xf32>
    %189 = vector.broadcast %188 : vector<16x1xf32> to vector<16x32xf32>
    %190 = arith.subf %180, %189 : vector<16x32xf32>
    %191 = arith.mulf %190, %190 : vector<16x32xf32>
    %cst_61 = arith.constant dense<0.000000e+00> : vector<16xf32>
    %192 = vector.multi_reduction <add>, %191, %cst_61 [1] : vector<16x32xf32> to vector<16xf32>
    %193 = vector.shape_cast %192 : vector<16xf32> to vector<16x1xf32>
    %cst_62 = arith.constant 3.200000e+01 : f32
    %194 = vector.broadcast %cst_62 : f32 to vector<16x1xf32>
    %195 = arith.divf %193, %194 : vector<16x1xf32>
    %196 = vector.broadcast %188 : vector<16x1xf32> to vector<16x32xf32>
    %197 = arith.subf %180, %196 : vector<16x32xf32>
    %cst_63 = arith.constant 9.99999974E-6 : f32
    %198 = vector.broadcast %cst_63 : f32 to vector<16x1xf32>
    %199 = arith.addf %195, %198 : vector<16x1xf32>
    %200 = math.rsqrt %199 : vector<16x1xf32>
    %201 = vector.broadcast %200 : vector<16x1xf32> to vector<16x32xf32>
    %202 = arith.mulf %197, %201 : vector<16x32xf32>
    %203 = vector.broadcast %182 : vector<1x32xf32> to vector<16x32xf32>
    %204 = arith.mulf %202, %203 : vector<16x32xf32>
    %205 = vector.broadcast %184 : vector<1x32xf32> to vector<16x32xf32>
    %206 = arith.addf %204, %205 : vector<16x32xf32>
    %207 = arith.truncf %206 : vector<16x32xf32> to vector<16x32xbf16>
    %c0_64 = arith.constant 0 : index
    %c0_65 = arith.constant 0 : index
    %c0_66 = arith.constant 0 : index
    %208 = vector.load %arg12[%c0_64, %c0_65, %c0_66] : memref<1x32x128xf32, #tpu.memory_space<vmem>>, vector<1x32x128xf32>
    %209 = vector.shape_cast %208 : vector<1x32x128xf32> to vector<32x128xf32>
    %210 = arith.truncf %209 : vector<32x128xf32> to vector<32x128xbf16>
    %cst_67 = arith.constant dense<0.000000e+00> : vector<16x128xf32>
    %211 = tpu.matmul %207, %210, %cst_67 {dimension_numbers = #tpu.dot_dimension_numbers<[1], [0], [0], [1], [0, 0, 1, 1], [], []>} : vector<16x32xbf16>, vector<32x128xbf16>, vector<16x128xf32> -> vector<16x128xf32>
    %c0_68 = arith.constant 0 : index
    %c0_69 = arith.constant 0 : index
    %c0_70 = arith.constant 0 : index
    %212 = vector.load %arg13[%c0_68, %c0_69, %c0_70] : memref<1x1x128xf32, #tpu.memory_space<vmem>>, vector<1x1x128xf32>
    %213 = vector.shape_cast %212 : vector<1x1x128xf32> to vector<1x128xf32>
    %214 = vector.broadcast %213 : vector<1x128xf32> to vector<16x128xf32>
    %215 = arith.addf %211, %214 : vector<16x128xf32>
    %cst_71 = arith.constant 1.702000e+00 : f32
    %216 = vector.broadcast %cst_71 : f32 to vector<16x128xf32>
    %217 = arith.mulf %216, %215 : vector<16x128xf32>
    %218 = arith.negf %217 : vector<16x128xf32>
    %219 = math.exp %218 : vector<16x128xf32>
    %cst_72 = arith.constant 1.000000e+00 : f32
    %220 = vector.broadcast %cst_72 : f32 to vector<16x128xf32>
    %221 = arith.addf %220, %219 : vector<16x128xf32>
    %222 = arith.divf %220, %221 : vector<16x128xf32>
    %223 = arith.mulf %215, %222 : vector<16x128xf32>
    %224 = arith.truncf %223 : vector<16x128xf32> to vector<16x128xbf16>
    %c0_73 = arith.constant 0 : index
    %c0_74 = arith.constant 0 : index
    %c0_75 = arith.constant 0 : index
    %225 = vector.load %arg14[%c0_73, %c0_74, %c0_75] : memref<1x128x32xf32, #tpu.memory_space<vmem>>, vector<1x128x32xf32>
    %226 = vector.shape_cast %225 : vector<1x128x32xf32> to vector<128x32xf32>
    %227 = arith.truncf %226 : vector<128x32xf32> to vector<128x32xbf16>
    %cst_76 = arith.constant dense<0.000000e+00> : vector<16x32xf32>
    %228 = tpu.matmul %224, %227, %cst_76 {dimension_numbers = #tpu.dot_dimension_numbers<[1], [0], [0], [1], [0, 0, 1, 1], [], []>} : vector<16x128xbf16>, vector<128x32xbf16>, vector<16x32xf32> -> vector<16x32xf32>
    %229 = arith.addf %180, %228 : vector<16x32xf32>
    %c0_77 = arith.constant 0 : index
    %c0_78 = arith.constant 0 : index
    %c0_79 = arith.constant 0 : index
    %230 = vector.load %arg15[%c0_77, %c0_78, %c0_79] : memref<1x1x32xf32, #tpu.memory_space<vmem>>, vector<1x1x32xf32>
    %231 = vector.shape_cast %230 : vector<1x1x32xf32> to vector<1x32xf32>
    %232 = vector.broadcast %231 : vector<1x32xf32> to vector<16x32xf32>
    %233 = arith.addf %229, %232 : vector<16x32xf32>
    %234 = vector.shape_cast %233 : vector<16x32xf32> to vector<2x8x32xf32>
    %c0_80 = arith.constant 0 : index
    %c0_81 = arith.constant 0 : index
    %c0_82 = arith.constant 0 : index
    %235 = vector.load %arg17[%c0_80, %c0_81, %c0_82] : memref<2x8x32xf32, #tpu.memory_space<vmem>>, vector<2x8x32xf32>
    tpu.vector_store %arg17[%c0_80, %c0_81, %c0_82], %234 {strides = array<i32>} : memref<2x8x32xf32, #tpu.memory_space<vmem>>, vector<2x8x32xf32>,
    %c1_i32 = arith.constant 1 : i32
    %236 = arith.cmpi eq, %arg1, %c1_i32 : i32
    %237 = arith.extui %236 : i1 to i32
    %c0_i32_83 = arith.constant 0 : i32
    %238 = arith.cmpi ne, %237, %c0_i32_83 : i32
    scf.if %238 {
      %c0_84 = arith.constant 0 : index
      %c0_85 = arith.constant 0 : index
      %c0_86 = arith.constant 0 : index
      %239 = vector.load %arg17[%c0_84, %c0_85, %c0_86] : memref<2x8x32xf32, #tpu.memory_space<vmem>>, vector<2x8x32xf32>
      %c0_87 = arith.constant 0 : index
      %c0_88 = arith.constant 0 : index
      %c0_89 = arith.constant 0 : index
      %240 = vector.load %arg16[%c0_87, %c0_88, %c0_89] : memref<2x8x32xf32, #tpu.memory_space<vmem>>, vector<2x8x32xf32>
      tpu.vector_store %arg16[%c0_87, %c0_88, %c0_89], %239 {strides = array<i32>} : memref<2x8x32xf32, #tpu.memory_space<vmem>>, vector<2x8x32xf32>,
    } else {
    }
    return
  }
  func.func @transform_0(%arg0: i32, %arg1: i32) -> (i32, i32, i32) {
    %c0_i32 = arith.constant 0 : i32
    %c0_i32_0 = arith.constant 0 : i32
    %c0_i32_1 = arith.constant 0 : i32
    return %arg0, %c0_i32, %c0_i32_0 : i32, i32, i32
  }
  func.func @transform_1(%arg0: i32, %arg1: i32) -> (i32, i32) {
    %c0_i32 = arith.constant 0 : i32
    %c0_i32_0 = arith.constant 0 : i32
    %c0_i32_1 = arith.constant 0 : i32
    return %c0_i32, %c0_i32_0 : i32, i32
  }
  func.func @transform_2(%arg0: i32, %arg1: i32) -> (i32, i32, i32) {
    %c0_i32 = arith.constant 0 : i32
    %c0_i32_0 = arith.constant 0 : i32
    %c0_i32_1 = arith.constant 0 : i32
    return %arg1, %c0_i32, %c0_i32_0 : i32, i32, i32
  }
  func.func @transform_3(%arg0: i32, %arg1: i32) -> (i32, i32, i32) {
    %c0_i32 = arith.constant 0 : i32
    %c0_i32_0 = arith.constant 0 : i32
    %c0_i32_1 = arith.constant 0 : i32
    return %arg1, %c0_i32, %c0_i32_0 : i32, i32, i32
  }
  func.func @transform_4(%arg0: i32, %arg1: i32) -> (i32, i32, i32) {
    %c0_i32 = arith.constant 0 : i32
    %c0_i32_0 = arith.constant 0 : i32
    %c0_i32_1 = arith.constant 0 : i32
    return %arg1, %c0_i32, %c0_i32_0 : i32, i32, i32
  }
  func.func @transform_5(%arg0: i32, %arg1: i32) -> (i32, i32, i32) {
    %c0_i32 = arith.constant 0 : i32
    %c0_i32_0 = arith.constant 0 : i32
    %c0_i32_1 = arith.constant 0 : i32
    return %arg1, %c0_i32, %c0_i32_0 : i32, i32, i32
  }
  func.func @transform_6(%arg0: i32, %arg1: i32) -> (i32, i32, i32) {
    %c0_i32 = arith.constant 0 : i32
    %c0_i32_0 = arith.constant 0 : i32
    %c0_i32_1 = arith.constant 0 : i32
    return %arg1, %c0_i32, %c0_i32_0 : i32, i32, i32
  }
  func.func @transform_7(%arg0: i32, %arg1: i32) -> (i32, i32, i32) {
    %c0_i32 = arith.constant 0 : i32
    %c0_i32_0 = arith.constant 0 : i32
    %c0_i32_1 = arith.constant 0 : i32
    return %arg1, %c0_i32, %c0_i32_0 : i32, i32, i32
  }
  func.func @transform_8(%arg0: i32, %arg1: i32) -> (i32, i32, i32) {
    %c0_i32 = arith.constant 0 : i32
    %c0_i32_0 = arith.constant 0 : i32
    %c0_i32_1 = arith.constant 0 : i32
    return %arg1, %c0_i32, %c0_i32_0 : i32, i32, i32
  }
  func.func @transform_9(%arg0: i32, %arg1: i32) -> (i32, i32, i32) {
    %c0_i32 = arith.constant 0 : i32
    %c0_i32_0 = arith.constant 0 : i32
    %c0_i32_1 = arith.constant 0 : i32
    return %arg1, %c0_i32, %c0_i32_0 : i32, i32, i32
  }
  func.func @transform_10(%arg0: i32, %arg1: i32) -> (i32, i32, i32) {
    %c0_i32 = arith.constant 0 : i32
    %c0_i32_0 = arith.constant 0 : i32
    %c0_i32_1 = arith.constant 0 : i32
    return %arg1, %c0_i32, %c0_i32_0 : i32, i32, i32
  }
  func.func @transform_11(%arg0: i32, %arg1: i32) -> (i32, i32, i32) {
    %c0_i32 = arith.constant 0 : i32
    %c0_i32_0 = arith.constant 0 : i32
    %c0_i32_1 = arith.constant 0 : i32
    return %arg1, %c0_i32, %c0_i32_0 : i32, i32, i32
  }
  func.func @transform_12(%arg0: i32, %arg1: i32) -> (i32, i32, i32) {
    %c0_i32 = arith.constant 0 : i32
    %c0_i32_0 = arith.constant 0 : i32
    %c0_i32_1 = arith.constant 0 : i32
    return %arg1, %c0_i32, %c0_i32_0 : i32, i32, i32
  }
  func.func @transform_13(%arg0: i32, %arg1: i32) -> (i32, i32, i32) {
    %c0_i32 = arith.constant 0 : i32
    %c0_i32_0 = arith.constant 0 : i32
    %c0_i32_1 = arith.constant 0 : i32
    return %arg1, %c0_i32, %c0_i32_0 : i32, i32, i32
  }
  func.func @transform_14(%arg0: i32, %arg1: i32) -> (i32, i32, i32) {
    %c0_i32 = arith.constant 0 : i32
    %c0_i32_0 = arith.constant 0 : i32
    %c0_i32_1 = arith.constant 0 : i32
    return %arg0, %c0_i32, %c0_i32_0 : i32, i32, i32
  }
}

</mosaic_0001>

<bundles_post_ra>
// kernel: tpu_custom_call.1
= control target key start
LH: loop header
LB: loop body
LE: loop exit
PB: predicated region body
PF: predicated region fallthrough
CT: control target
= control target key end

     0   :  { %s3227_s0 = inlined_call_operand.vmem [shape: f32[2,8,32], index: 0, kind: input, shape index: {}]   ;;  %s3228_s1 = inlined_call_operand.vmem [shape: f32[8,32], index: 1, kind: input, shape index: {}]   ;;  %s3229_s2 = inlined_call_operand.vmem [shape: f32[2,1,32], index: 2, kind: input, shape index: {}]   ;;  %s3230_s3 = inlined_call_operand.vmem [shape: f32[2,1,32], index: 3, kind: input, shape index: {}]   ;;  %s3231_s4 = inlined_call_operand.vmem [shape: f32[2,32,96], index: 4, kind: input, shape index: {}]   ;;  %s3232_s5 = inlined_call_operand.vmem [shape: f32[2,1,96], index: 5, kind: input, shape index: {}]   ;;  %s3233_s6 = inlined_call_operand.vmem [shape: f32[2,32,32], index: 6, kind: input, shape index: {}]   ;;  %s3234_s7 = inlined_call_operand.vmem [shape: f32[2,1,32], index: 7, kind: input, shape index: {}]   ;;  %s3235_s8 = inlined_call_operand.vmem [shape: f32[2,1,32], index: 8, kind: input, shape index: {}]   ;;  %s3236_s9 = inlined_call_operand.vmem [shape: f32[2,1,32], index: 9, kind: input, shape index: {}]   ;;  %s3237_s10 = inlined_call_operand.vmem [shape: f32[2,32,128], index: 10, kind: input, shape index: {}]   ;;  %s3238_s11 = inlined_call_operand.vmem [shape: f32[2,1,128], index: 11, kind: input, shape index: {}]   ;;  %s3239_s12 = inlined_call_operand.vmem [shape: f32[2,128,32], index: 12, kind: input, shape index: {}]   ;;  %s3240_s13 = inlined_call_operand.vmem [shape: f32[2,1,32], index: 13, kind: input, shape index: {}]   ;;  %s3241_s14 = inlined_call_operand.hbm [shape: f32[2,8,32], index: 14, kind: output, shape index: {}]  }
   0x1   :  { %3246 = sst [smem:[#allocation11_spill]] %s3230_s3 }
   0x2   :  { %3247 = sst [smem:[#allocation12_spill]] %s3231_s4 }
   0x3   :  { %3248 = sst [smem:[#allocation13_spill]] %s3233_s6 }
   0x4   :  { %3249 = sst [smem:[#allocation14_spill]] %s3241_s14 }
   0x5   :  { %19 = vsyncpa [#allocation5], 0  ;;  %s2804_s29 = smov 0   ;;  %s2806_s30 = smov 0  }
   0x6   :  { %s2808_s15 = smov 0  }
   0x7 LB: > { %3250 = sst [smem:[#allocation7_spill]] %s2706_s30  ;;  %s34_s17 = sadd.s32 1, %s2706_s30  ;;  %s2710_s15 = sphi %s2808_s15, %s25_s15   ;;  %s2706_s30 = sphi %s2806_s30, %s3269_s30   ;;  %s2702_s29 = sphi %s2804_s29, %s3268_s29  }
   0x8   : > { %3251 = sst [smem:[#allocation8_spill]] %s2710_s15  ;;  %p35_p0 = scmp.ge.s32.totalorder %s34_s17, 2 }
   0x9   : > { %p2301_p1 = scmp.ge.s32.totalorder %s2710_s15, 1  ;;  %p530_p2 = scmp.lt.s32.totalorder %s2710_s15, 3 }
   0xa   : > { %s3271_s17 = smov (%p35_p0, %s34_s17), 0 }
   0xb   : > { %3252 = sst [smem:[#allocation9_spill]] %s3271_s17  ;;  %p531_p3 = pnand %p2301_p1, %p530_p2 }
   0xd   : > { %534 = sbr.rel (%p531_p3) target bundleno = 4541 (0x11bd), region = 76 }
  0x14   : > { %p621_p4 = scmp.lt.s32.totalorder %s2702_s29, 1  ;;  %s3254_s4 = sld [smem:[#allocation12_spill]] }
  0x15   : > { %s3255_s6 = sld [smem:[#allocation13_spill]]  ;;  %p2310_p5 = scmp.ne.s32.totalorder %s2702_s29, 0 }
  0x16   : > { %s2827_s18 = scalar_select %p621_p4, %s2702_s29, 1 }
  0x17   : > { %670 = sbr.rel (%p2310_p5) target bundleno = 30 (0x1e), region = 80  ;;  %v671_v0 = vld [vmem:[%s3227_s0] sm:$0xff] (!%p2310_p5)  ;;  %vm676_vm0 = vcmask (!%p2310_p5), 261120   ;;  %v672_v2 = vld [vmem:[%s3227_s0 + $0x8] sm:$0xff] (!%p2310_p5)  ;;  %v679_v3 = vlaneseq (!%p2310_p5)  ;;  %vm685_vm1 = vcmask (!%p2310_p5), 64512  }
  0x18   : > { %s2348_s25 = sshll.u32 %s2827_s18, 5  ;;  %s645_s3 = scalar_lea.vmem %s3235_s8, %s2827_s18  ;;  %v673_v1 = vld [vmem:[%s3228_s1] sm:$0xff] (!%p2310_p5)  ;;  %v2712_v8 = vmov (!%p2310_p5), -1e+30  }
  0x19   : > { %s648_s28 = scalar_lea.vmem %s3236_s9, %s2827_s18  ;;  %s664_s26 = scalar_lea.vmem %s3240_s13, %s2827_s18  ;;  %v674_v4 = vadd.f32 (!%p2310_p5), %v673_v1, %v671_v0  ;;  %v675_v5 = vadd.f32 (!%p2310_p5), %v673_v1, %v672_v2  ;;  %v680_v6 = vshrl.u32 (!%p2310_p5), %v679_v3, 7  ;;  %v682_v7 = vand.u32 (!%p2310_p5), 127, %v679_v3 }
  0x1a   : > { %s2845_s16 = scalar_lea.vmem %s3254_s4, %s2348_s25  ;;  %s2867_s4 = scalar_lea.vmem %s3237_s10, %s2348_s25 }
  0x1b   : > { %s2850_s14 = scalar_lea.vmem %s3255_s6, %s2348_s25  ;;  %s656_s6 = scalar_lea.vmem %s3238_s11, %s2827_s18  ;;  %677 = vst.msk [vmem:[#allocation2] sm:$0xff] (!%p2310_p5), %vm676_vm0, %v674_v4  ;;  %678 = vst.msk [vmem:[#allocation2 + $0x8] sm:$0xff] (!%p2310_p5), %vm676_vm0, %v675_v5  ;;  %vm683_vm2 = vcmp.le.s32.totalorder (!%p2310_p5), %v682_v7, %v680_v6 }
  0x1c   : > { %3256 = sst [smem:[#allocation10_spill]] %s2850_s14  ;;  %s2351_s14 = sshll.u32 %s2827_s18, 7  ;;  %v684_v9 = vsel (!%p2310_p5), %vm683_vm2, 0.0, %v2712_v8 }
  0x1d   : > { %s2877_s22 = scalar_lea.vmem %s3239_s12, %s2351_s14  ;;  %686 = vst.msk [vmem:[#allocation3] sm:$0xff] (!%p2310_p5), %vm685_vm1, %v684_v9 }
  0x1e PF: > { %vm692_vm3 = vcmask 261120   ;;  %v737_v24 = vld [vmem:[%s2845_s16] sm:$0xff]  ;;  %v738_v25 = vld [vmem:[%s2845_s16 + $0x8] sm:$0xff]  ;;  %v2713_v27 = vmov 0.0   ;;  %v739_v28 = vld [vmem:[%s2845_s16 + $0x10] sm:$0xff]  ;;  %vm2714_vm4 = vmmov 0   ;;  %s3257_s15 = scalar_lea.vmem %s3229_s2, %s2827_s18  ;;  %s3260_s20 = scalar_lea.vmem %s3232_s5, %s2827_s18 }
  0x1f   : > { %v741_v26 = vpack.c.bf16 %v738_v25, %v737_v24  ;;  %2407 = vmatprep.subr.bf16.mxu1 %v2713_v27  ;;  %v740_v29 = vld [vmem:[%s2845_s16 + $0x18] sm:$0xff]  ;;  %2433 = vmatprep.subr.bf16.mxu0 %v2713_v27  ;;  %v2311_v39 = vld [vmem:[%s3257_s15] ss:$0 sm:$0xff]  ;;  %s3258_s23 = sld [smem:[#allocation11_spill]]  ;;  %s2715_s30 = smov 96   ;;  %vm803_vm5 = vcmask 64512  }
  0x20   : > { %v742_v30 = vpack.c.bf16 %v740_v29, %v739_v28  ;;  %2411 = vmatprep.mubr.msk.bf16.mxu1 %vm2714_vm4, %v2713_v27  ;;  %2435 = vmatprep.mubr.msk.bf16.mxu0 %vm2714_vm4, %v2713_v27  ;;  %v2313_v48 = vld [vmem:[%s3260_s20] ss:$0 sm:$0xff]  ;;  %s2716_s17 = smov 64   ;;  %s2717_s14 = smov 88   ;;  %vm932_vm6 = vcmask 1043456  }
  0x21   : > { %2408 = vmatpush3.bf16.msra.mxu1 %v741_v26  ;;  %s2718_s16 = smov 120   ;;  %s2719_s15 = smov 56  }
  0x22   : > { %v2893_v10 = vld [vmem:[#allocation2] sm:$0xff]  ;;  %v2895_v11 = vld [vmem:[#allocation2 + $0x8] sm:$0xff]  ;;  %2409 = vmatprep.subr.bf16.mxu1 %v2713_v27  ;;  %s2720_s21 = smov 80   ;;  %s2721_s24 = smov 112  }
  0x23   : > { %v693_v12 = vsel %vm692_vm3, %v2893_v10, 0.0  ;;  %v696_v13 = vsel %vm692_vm3, %v2895_v11, 0.0  ;;  %s2723_s25 = smov 72   ;;  %s2724_s19 = smov 104  }
  0x24   : > { %694 = vadd.xlane.f32.xlu0 %v693_v12  ;;  %v2953_v62 = vld [vmem:[#allocation3] sm:$0xff]  ;;  %s2725_s20 = smov 40   ;;  %p2343_p6 = scmp.ne.s32.totalorder %s2702_s29, 1 }
  0x25   : > { %2410 = vmatpush3.bf16.msra.mxu1 %v742_v30  ;;  %s3259_s27 = scalar_lea.vmem %s3258_s23, %s2827_s18  ;;  %s3261_s23 = sld [smem:[#allocation10_spill]] }
  0x26   : > { %2415 = vmatprep.subr.bf16.mxu1 %v2713_v27  ;;  %v2312_v43 = vld [vmem:[%s3259_s27] ss:$0 sm:$0xff]  ;;  %s2722_s27 = smov 48  }
  0x28   : > { %697 = vadd.xlane.f32.xlu0 %v696_v13 }
  0xb1   : > { %v695_v14 = vpop.xlane.xlu0 %694 }
  0xb2   : > { %v700_v15 = vmul.f32 0.03125, %v695_v14 }
  0xb4   : > { %v702_v16 = vsub.f32 %v2893_v10, %v700_v15 }
  0xb5   : > { %v698_v17 = vpop.xlane.xlu0 %697 }
  0xb6   : > { %v701_v18 = vmul.f32 0.03125, %v698_v17  ;;  %v704_v19 = vmul.f32 %v702_v16, %v702_v16 }
  0xb8   : > { %v703_v20 = vsub.f32 %v2895_v11, %v701_v18  ;;  %v706_v21 = vsel %vm692_vm3, %v704_v19, 0.0 }
  0xb9   : > { %707 = vadd.xlane.f32.xlu1 %v706_v21 }
  0xba   : > { %v705_v22 = vmul.f32 %v703_v20, %v703_v20 }
  0xbc   : > { %v709_v23 = vsel %vm692_vm3, %v705_v22, 0.0 }
  0xbd   : > { %710 = vadd.xlane.f32.xlu1 %v709_v23 }
 0x146   : > { %v708_v31 = vpop.xlane.xlu1 %707 }
 0x147   : > { %v712_v32 = vmul.f32 0.03125, %v708_v31 }
 0x149   : > { %v714_v33 = vadd.f32 1e-05, %v712_v32 }
 0x14a   : > { %v711_v34 = vpop.xlane.xlu1 %710 }
 0x14b   : > { %2610 = vrsqrt.f32 %v714_v33  ;;  %v713_v35 = vmul.f32 0.03125, %v711_v34 }
 0x14d   : > { %v715_v36 = vadd.f32 1e-05, %v713_v35 }
 0x14f   : > { %2612 = vrsqrt.f32 %v715_v36 }
 0x155   : > { %v2611_v37 = vpop.eup %2610 }
 0x156   : > { %v718_v38 = vmul.f32 %v2611_v37, %v702_v16 }
 0x158   : > { %v726_v42 = vmul.f32 %v2311_v39, %v718_v38 }
 0x159   : > { %v2613_v40 = vpop.eup %2612 }
 0x15a   : > { %v719_v41 = vmul.f32 %v2613_v40, %v703_v20  ;;  %v734_v45 = vadd.f32 %v2312_v43, %v726_v42 }
 0x15c   : > { %v727_v44 = vmul.f32 %v2311_v39, %v719_v41 }
 0x15e   : > { %v735_v46 = vadd.f32 %v2312_v43, %v727_v44 }
 0x160   : > { %v736_v47 = vpack.c.bf16 %v735_v46, %v734_v45 }
 0x162   : > { %2412 = vmatmul.mubr.msk.bf16.vlgmr.msra.gmra.mrb[0].mxu1 %vm692_vm3, %v736_v47 }
 0x163   : > { %2417 = vmatprep.mubr.msk.bf16.mxu1 %vm2714_vm4, %v2713_v27 }
 0x235   : > { %v787_v49 = vpop.f32.mrb[0].mxu1 }
 0x236   : > { %v788_v50 = vadd.f32 %v2313_v48, %v787_v49  ;;  %v2413_v51 = vpop.f32.mrb[1].mxu1 }
 0x237   : > { %v790_v52 = vpop.f32.mrb[2].mxu1 }
 0x238   : > { %v2935_v53 = vpack.c.bf16 %v788_v50, %v788_v50  ;;  %v791_v54 = vadd.f32 %v2313_v48, %v790_v52  ;;  %v2414_v55 = vpop.f32.mrb[3].mxu1 }
 0x23a   : > { %v2937_v56 = vpack.c.bf16 %v791_v54, %v791_v54  ;;  %801 = vrot.lane.b32.xlu0 %v2935_v53, %s2715_s30 }
 0x23c   : > { %851 = vrot.lane.b32.xlu1 %v2937_v56, %s2715_s30 }
 0x2ac   : > { %v802_v57 = vpop.permute.xlu0 %801 }
 0x2ad   : > { %v808_v58 = vsel %vm803_vm5, %v802_v57, 0 }
 0x2ae   : > { %2416 = vmatpush3.bf16.xpose.msra.mxu1 %v808_v58  ;;  %v852_v59 = vpop.permute.xlu1 %851 }
 0x2af   : > { %2421 = vmatprep.subr.bf16.mxu1 %v2713_v27  ;;  %v857_v60 = vsel %vm803_vm5, %v852_v59, 0 }
 0x2b5   : > { %2418 = vmatmul.mubr.msk.bf16.vlgmr.msra.gmra.mrb[4].mxu1 %vm803_vm5, %v2935_v53 }
 0x2b6   : > { %2422 = vmatpush3.bf16.xpose.msra.mxu1 %v857_v60  ;;  %2423 = vmatprep.mubr.msk.bf16.mxu1 %vm2714_vm4, %v2713_v27 }
 0x2b7   : > { %2427 = vmatprep.subr.bf16.mxu1 %v2713_v27 }
 0x2bd   : > { %2424 = vmatmul.mubr.msk.bf16.vlgmr.msra.gmra.mrb[8].mxu1 %vm803_vm5, %v2937_v56 }
 0x2be   : > { %2429 = vmatprep.mubr.msk.bf16.mxu1 %vm2714_vm4, %v2713_v27 }
 0x388   : > { %v844_v61 = vpop.f32.mrb[4].mxu1 }
 0x389   : > { %v899_v63 = vmul.f32 0.35355338, %v844_v61  ;;  %v2419_v0 = vpop.f32.mrb[5].mxu1 }
 0x38a   : > { %v847_v1 = vpop.f32.mrb[6].mxu1 }
 0x38b   : > { %v2420_v2 = vpop.f32.mrb[7].mxu1  ;;  %v901_v3 = vadd.f32 %v899_v63, %v2953_v62 }
 0x38d   : > { %v903_v4 = vsel %vm803_vm5, %v901_v3, -inf }
 0x38e   : > { %904 = vmax.xlane.f32.xlu1 %v903_v4 }
 0x390   : > { %v893_v5 = vpop.f32.mrb[8].mxu1 }
 0x391   : > { %v900_v6 = vmul.f32 0.35355338, %v893_v5  ;;  %v2425_v7 = vpop.f32.mrb[9].mxu1 }
 0x392   : > { %v896_v8 = vpop.f32.mrb[10].mxu1 }
 0x393   : > { %v2426_v9 = vpop.f32.mrb[11].mxu1  ;;  %v902_v12 = vadd.f32 %v900_v6, %v2953_v62 }
 0x395   : > { %v906_v13 = vsel %vm803_vm5, %v902_v12, -inf }
 0x396   : > { %907 = vmax.xlane.f32.xlu0 %v906_v13 }
 0x39f   : > { %976 = vrot.lane.b32.xlu1 %v2937_v56, %s2716_s17 }
 0x3a3   : > { %1028 = vrot.lane.b32.xlu1 %v2935_v53, %s2717_s14 }
 0x41b   : > { %v905_v14 = vpop.xlane.xlu1 %904 }
 0x41c   : > { %v909_v15 = vsub.f32 %v901_v3, %v905_v14 }
 0x41e   : > { %v911_v16 = vmul.f32 1.442695, %v909_v15 }
 0x41f   : > { %v977_v17 = vpop.permute.xlu1 %976 }
 0x420   : > { %2614 = vpow2.f32 %v911_v16  ;;  %v982_v18 = vsel %vm932_vm6, %v977_v17, 0 }
 0x421   : > { %2434 = vmatpush3.bf16.msra.mxu0 %v982_v18 }
 0x422   : > { %2445 = vmatprep.subr.bf16.mxu0 %v2713_v27 }
 0x423   : > { %v908_v19 = vpop.xlane.xlu0 %907  ;;  %v1029_v28 = vpop.permute.xlu1 %1028 }
 0x424   : > { %v910_v20 = vsub.f32 %v902_v12, %v908_v19  ;;  %v1034_v35 = vsel %vm803_vm5, %v1029_v28, 0 }
 0x426   : > { %v913_v21 = vmul.f32 1.442695, %v910_v20 }
 0x428   : > { %2616 = vpow2.f32 %v913_v21 }
 0x42a   : > { %v2615_v22 = vpop.eup %2614 }
 0x42b   : > { %v915_v23 = vsel %vm803_vm5, %v2615_v22, 0.0 }
 0x42c   : > { %916 = vadd.xlane.f32.xlu0 %v915_v23 }
 0x432   : > { %v2617_v24 = vpop.eup %2616 }
 0x433   : > { %v918_v25 = vsel %vm803_vm5, %v2617_v24, 0.0 }
 0x434   : > { %919 = vadd.xlane.f32.xlu1 %v918_v25 }
 0x442   : > { %927 = vrot.lane.b32.xlu0 %v2935_v53, %s2716_s17 }
 0x445   : > { %1078 = vrot.lane.b32.xlu1 %v2937_v56, %s2717_s14  ;;  %s3262_s14 = scalar_lea.vmem %s3234_s7, %s2827_s18 }
 0x446   : > { %1026 = vrot.lane.b32.xlu0 %v2935_v53, %s2718_s16 }
 0x449   : > { %1076 = vrot.lane.b32.xlu1 %v2937_v56, %s2718_s16 }
 0x4b9   : > { %v917_v26 = vpop.xlane.xlu0 %916 }
 0x4ba   : > { %2618 = vrcp.f32 %v917_v26  ;;  %v794_v26 = vld [vmem:[%s3261_s23] sm:$0xff] }
 0x4bb   : > { %v1025_v28 = vpack.c.bf16 %v794_v26, %v794_v26 }
 0x4bd   : > { %v928_v29 = vpop.permute.xlu0 %927 }
 0x4be   : > { %v934_v30 = vsel %vm932_vm6, %v928_v29, 0 }
 0x4bf   : > { %2428 = vmatpush3.bf16.msra.mxu1 %v934_v30 }
 0x4c0   : > { %2439 = vmatprep.subr.bf16.mxu1 %v2713_v27 }
 0x4c1   : > { %v920_v31 = vpop.xlane.xlu1 %919  ;;  %v1027_v40 = vpop.permute.xlu0 %1026 }
 0x4c2   : > { %2620 = vrcp.f32 %v920_v31 }
 0x4c4   : > { %v2619_v32 = vpop.eup %2618 }
 0x4c5   : > { %v923_v33 = vmul.f32 %v2619_v32, %v2615_v22  ;;  %v1079_v38 = vpop.permute.xlu1 %1078  ;;  %v1303_v32 = vsel %vm932_vm6, %v1025_v28, 0 }
 0x4c6   : > { %v1084_v41 = vsel %vm803_vm5, %v1079_v38, 0 }
 0x4c7   : > { %v925_v34 = vpack.c.bf16 %v923_v33, %v923_v33 }
 0x4c9   : > { %2430 = vmatmul.mubr.msk.bf16.vlgmr.msra.gmra.mrb[12].mxu1 %vm803_vm5, %v925_v34  ;;  %v1077_v42 = vpop.permute.xlu1 %1076 }
 0x4ca   : > { %2440 = vmatpush3.bf16.xpose.msra.mxu1 %v1034_v35  ;;  %2441 = vmatprep.mubr.msk.bf16.mxu1 %vm2714_vm4, %v2713_v27 }
 0x4cb   : > { %2451 = vmatprep.subr.bf16.mxu1 %v2713_v27 }
 0x4cc   : > { %v2621_v36 = vpop.eup %2620 }
 0x4cd   : > { %v924_v37 = vmul.f32 %v2621_v36, %v2617_v24 }
 0x4cf   : > { %v926_v39 = vpack.c.bf16 %v924_v37, %v924_v37  ;;  %v795_v37 = vld [vmem:[%s3261_s23 + $0x8] sm:$0xff] }
 0x4d0   : > { %v1251_v38 = vpack.c.bf16 %v795_v37, %v795_v37 }
 0x4d1   : > { %2436 = vmatmul.mubr.msk.bf16.vlgmr.msra.gmra.mrb[0].mxu0 %vm803_vm5, %v926_v39  ;;  %2442 = vmatmul.mubr.msk.bf16.vlgmr.msra.gmra.mrb[16].mxu1 %vm803_vm5, %v1027_v40 }
 0x4d2   : > { %2446 = vmatpush3.bf16.xpose.msra.mxu0 %v1084_v41  ;;  %2447 = vmatprep.mubr.msk.bf16.mxu0 %vm2714_vm4, %v2713_v27  ;;  %v1256_v39 = vsel %vm932_vm6, %v1251_v38, 0 }
 0x4d3   : > { %2457 = vmatprep.subr.bf16.mxu0 %v2713_v27  ;;  %2453 = vmatprep.mubr.msk.bf16.mxu1 %vm2714_vm4, %v2713_v27 }
 0x4d9   : > { %2448 = vmatmul.mubr.msk.bf16.vlgmr.msra.gmra.mrb[4].mxu0 %vm803_vm5, %v1077_v42 }
 0x4da   : > { %2459 = vmatprep.mubr.msk.bf16.mxu0 %vm2714_vm4, %v2713_v27 }
 0x59c   : > { %v2987_v43 = vpop.f32.mrb[12].mxu1 }
 0x59d   : > { %v2431_v44 = vpop.f32.mrb[13].mxu1 }
 0x59e   : > { %v973_v45 = vpop.f32.mrb[14].mxu1 }
 0x59f   : > { %v2432_v46 = vpop.f32.mrb[15].mxu1 }
 0x5a4   : > { %v2989_v47 = vpop.f32.mrb[0].mxu0  ;;  %v1070_v48 = vpop.f32.mrb[16].mxu1 }
 0x5a5   : > { %v1024_v49 = vpack.c.bf16 %v2989_v47, %v2987_v43  ;;  %v1126_v50 = vmul.f32 0.35355338, %v1070_v48  ;;  %v2437_v51 = vpop.f32.mrb[1].mxu0  ;;  %v2443_v52 = vpop.f32.mrb[17].mxu1 }
 0x5a6   : > { %v1021_v54 = vpop.f32.mrb[2].mxu0  ;;  %v1073_v55 = vpop.f32.mrb[18].mxu1 }
 0x5a7   : > { %v2438_v57 = vpop.f32.mrb[3].mxu0  ;;  %v2444_v58 = vpop.f32.mrb[19].mxu1  ;;  %v1128_v59 = vadd.f32 %v1126_v50, %v2953_v62 }
 0x5a9   : > { %v1130_v60 = vsel %vm803_vm5, %v1128_v59, -inf }
 0x5aa   : > { %1131 = vmax.xlane.f32.xlu0 %v1130_v60 }
 0x5ac   : > { %v1120_v61 = vpop.f32.mrb[4].mxu0 }
 0x5ad   : > { %v1127_v63 = vmul.f32 0.35355338, %v1120_v61  ;;  %v2449_v0 = vpop.f32.mrb[5].mxu0 }
 0x5ae   : > { %v1123_v1 = vpop.f32.mrb[6].mxu0 }
 0x5af   : > { %v2450_v2 = vpop.f32.mrb[7].mxu0  ;;  %v1129_v3 = vadd.f32 %v1127_v63, %v2953_v62 }
 0x5b1   : > { %v1133_v4 = vsel %vm803_vm5, %v1129_v3, -inf }
 0x5b2   : > { %1134 = vmax.xlane.f32.xlu1 %v1133_v4 }
 0x5c3   : > { %1202 = vrot.lane.b32.xlu1 %v2937_v56, %s2719_s15 }
 0x5c7   : > { %1348 = vrot.lane.b32.xlu1 %v2935_v53, %s2720_s21 }
 0x5cb   : > { %1398 = vrot.lane.b32.xlu1 %v2937_v56, %s2720_s21 }
 0x5cf   : > { %1396 = vrot.lane.b32.xlu1 %v2937_v56, %s2721_s24 }
 0x637   : > { %v1132_v5 = vpop.xlane.xlu0 %1131 }
 0x638   : > { %v1136_v6 = vsub.f32 %v1128_v59, %v1132_v5 }
 0x63a   : > { %v1138_v7 = vmul.f32 1.442695, %v1136_v6 }
 0x63c   : > { %2622 = vpow2.f32 %v1138_v7 }
 0x63f   : > { %v1135_v8 = vpop.xlane.xlu1 %1134 }
 0x640   : > { %v1137_v9 = vsub.f32 %v1129_v3, %v1135_v8 }
 0x642   : > { %v1140_v12 = vmul.f32 1.442695, %v1137_v9 }
 0x643   : > { %v1203_v13 = vpop.permute.xlu1 %1202 }
 0x644   : > { %2624 = vpow2.f32 %v1140_v12  ;;  %v1208_v14 = vsel %vm932_vm6, %v1203_v13, 0 }
 0x645   : > { %2458 = vmatpush3.bf16.msra.mxu0 %v1208_v14 }
 0x646   : > { %v2623_v15 = vpop.eup %2622  ;;  %2469 = vmatprep.subr.bf16.mxu0 %v2713_v27 }
 0x647   : > { %v1142_v16 = vsel %vm803_vm5, %v2623_v15, 0.0  ;;  %v1349_v33 = vpop.permute.xlu1 %1348 }
 0x648   : > { %1143 = vadd.xlane.f32.xlu0 %v1142_v16  ;;  %v1354_v48 = vsel %vm803_vm5, %v1349_v33, 0 }
 0x64b   : > { %v1399_v34 = vpop.permute.xlu1 %1398 }
 0x64c   : > { %v1404_v35 = vsel %vm803_vm5, %v1399_v34, 0 }
 0x64e   : > { %v2625_v17 = vpop.eup %2624 }
 0x64f   : > { %v1145_v18 = vsel %vm803_vm5, %v2625_v17, 0.0  ;;  %v1397_v36 = vpop.permute.xlu1 %1396 }
 0x650   : > { %1146 = vadd.xlane.f32.xlu0 %v1145_v18 }
 0x666   : > { %1154 = vrot.lane.b32.xlu0 %v2935_v53, %s2719_s15 }
 0x66a   : > { %1346 = vrot.lane.b32.xlu0 %v2935_v53, %s2721_s24 }
 0x6d5   : > { %v1144_v19 = vpop.xlane.xlu0 %1143 }
 0x6d6   : > { %2626 = vrcp.f32 %v1144_v19 }
 0x6dd   : > { %v1147_v20 = vpop.xlane.xlu0 %1146 }
 0x6de   : > { %2628 = vrcp.f32 %v1147_v20 }
 0x6e0   : > { %v2627_v21 = vpop.eup %2626 }
 0x6e1   : > { %v1150_v22 = vmul.f32 %v2627_v21, %v2623_v15  ;;  %v1155_v23 = vpop.permute.xlu0 %1154 }
 0x6e2   : > { %v1160_v24 = vsel %vm932_vm6, %v1155_v23, 0 }
 0x6e3   : > { %2452 = vmatpush3.bf16.msra.mxu1 %v1160_v24  ;;  %v1152_v25 = vpack.c.bf16 %v1150_v22, %v1150_v22 }
 0x6e4   : > { %2463 = vmatprep.subr.bf16.mxu1 %v2713_v27 }
 0x6e5   : > { %v1347_v52 = vpop.permute.xlu0 %1346 }
 0x6e6   : > { %2454 = vmatmul.mubr.msk.bf16.vlgmr.msra.gmra.mrb[20].mxu1 %vm803_vm5, %v1152_v25 }
 0x6e7   : > { %2465 = vmatprep.mubr.msk.bf16.mxu1 %vm2714_vm4, %v2713_v27  ;;  %2464 = vmatpush3.bf16.msra.mxu1 %v1256_v39 }
 0x6e8   : > { %v2629_v29 = vpop.eup %2628  ;;  %2475 = vmatprep.subr.bf16.mxu1 %v2713_v27 }
 0x6e9   : > { %v1151_v30 = vmul.f32 %v2629_v29, %v2625_v17 }
 0x6eb   : > { %v1153_v31 = vpack.c.bf16 %v1151_v30, %v1151_v30 }
 0x6ed   : > { %2460 = vmatmul.mubr.msk.bf16.vlgmr.msra.gmra.mrb[8].mxu0 %vm803_vm5, %v1153_v31 }
 0x6ee   : > { %2470 = vmatpush3.bf16.msra.mxu0 %v1303_v32  ;;  %2471 = vmatprep.mubr.msk.bf16.mxu0 %vm2714_vm4, %v2713_v27 }
 0x6ef   : > { %2481 = vmatprep.subr.bf16.mxu0 %v2713_v27 }
 0x6f5   : > { %2472 = vmatmul.mubr.msk.bf16.vlgmr.msra.gmra.mrb[12].mxu0 %vm803_vm5, %v1024_v49 }
 0x6f6   : > { %2483 = vmatprep.mubr.msk.bf16.mxu0 %vm2714_vm4, %v2713_v27 }
 0x6f7   : > { %2482 = vmatpush3.bf16.xpose.msra.mxu0 %v1404_v35 }
 0x6f8   : > { %2493 = vmatprep.subr.bf16.mxu0 %v2713_v27 }
 0x6fe   : > { %2484 = vmatmul.mubr.msk.bf16.vlgmr.msra.gmra.mrb[16].mxu0 %vm803_vm5, %v1397_v36 }
 0x6ff   : > { %2495 = vmatprep.mubr.msk.bf16.mxu0 %vm2714_vm4, %v2713_v27 }
 0x7b9   : > { %v1196_v40 = vpop.f32.mrb[20].mxu1 }
 0x7ba   : > { %v2455_v41 = vpop.f32.mrb[21].mxu1 }
 0x7bb   : > { %v1199_v42 = vpop.f32.mrb[22].mxu1 }
 0x7bc   : > { %v2456_v43 = vpop.f32.mrb[23].mxu1 }
 0x7c0   : > { %v1244_v44 = vpop.f32.mrb[8].mxu0 }
 0x7c1   : > { %v1250_v45 = vpack.c.bf16 %v1244_v44, %v1196_v40  ;;  %v2461_v46 = vpop.f32.mrb[9].mxu0 }
 0x7c2   : > { %v1247_v47 = vpop.f32.mrb[10].mxu0  ;;  %v796_v46 = vld [vmem:[%s3261_s23 + $0x10] sm:$0xff] }
 0x7c3   : > { %v2462_v49 = vpop.f32.mrb[11].mxu0  ;;  %2466 = vmatmul.mubr.msk.bf16.vlgmr.msra.gmra.mrb[24].mxu1 %vm803_vm5, %v1250_v45  ;;  %v1571_v47 = vpack.c.bf16 %v796_v46, %v796_v46 }
 0x7c4   : > { %2476 = vmatpush3.bf16.xpose.msra.mxu1 %v1354_v48  ;;  %2477 = vmatprep.mubr.msk.bf16.mxu1 %vm2714_vm4, %v2713_v27 }
 0x7c5   : > { %2487 = vmatprep.subr.bf16.mxu1 %v2713_v27  ;;  %v1576_v48 = vsel %vm932_vm6, %v1571_v47, 0 }
 0x7c8   : > { %v1339_v50 = vpop.f32.mrb[12].mxu0 }
 0x7c9   : > { %v2473_v51 = vpop.f32.mrb[13].mxu0 }
 0x7ca   : > { %v1342_v54 = vpop.f32.mrb[14].mxu0 }
 0x7cb   : > { %v2474_v55 = vpop.f32.mrb[15].mxu0  ;;  %2478 = vmatmul.mubr.msk.bf16.vlgmr.msra.gmra.mrb[28].mxu1 %vm803_vm5, %v1347_v52 }
 0x7cc   : > { %2489 = vmatprep.mubr.msk.bf16.mxu1 %vm2714_vm4, %v2713_v27 }
 0x7d1   : > { %v1440_v57 = vpop.f32.mrb[16].mxu0 }
 0x7d2   : > { %v1447_v58 = vmul.f32 0.35355338, %v1440_v57  ;;  %v2485_v59 = vpop.f32.mrb[17].mxu0 }
 0x7d3   : > { %v1443_v60 = vpop.f32.mrb[18].mxu0 }
 0x7d4   : > { %v2486_v61 = vpop.f32.mrb[19].mxu0  ;;  %v1449_v63 = vadd.f32 %v1447_v58, %v2953_v62 }
 0x7d6   : > { %v1453_v0 = vsel %vm803_vm5, %v1449_v63, -inf }
 0x7d7   : > { %1454 = vmax.xlane.f32.xlu1 %v1453_v0 }
 0x7e8   : > { %1522 = vrot.lane.b32.xlu1 %v2937_v56, %s2722_s27 }
 0x7ec   : > { %1623 = vrot.lane.b32.xlu1 %v2935_v53, %s2723_s25 }
 0x7f0   : > { %1673 = vrot.lane.b32.xlu1 %v2937_v56, %s2723_s25 }
 0x7f4   : > { %1671 = vrot.lane.b32.xlu1 %v2937_v56, %s2724_s19 }
 0x864   : > { %v1455_v1 = vpop.xlane.xlu1 %1454 }
 0x865   : > { %v1457_v4 = vsub.f32 %v1449_v63, %v1455_v1 }
 0x867   : > { %v1460_v5 = vmul.f32 1.442695, %v1457_v4 }
 0x868   : > { %v1523_v2 = vpop.permute.xlu1 %1522 }
 0x869   : > { %v1528_v3 = vsel %vm932_vm6, %v1523_v2, 0  ;;  %2630 = vpow2.f32 %v1460_v5 }
 0x86a   : > { %2494 = vmatpush3.bf16.msra.mxu0 %v1528_v3 }
 0x86b   : > { %2505 = vmatprep.subr.bf16.mxu0 %v2713_v27 }
 0x86c   : > { %v1624_v32 = vpop.permute.xlu1 %1623 }
 0x86d   : > { %v1629_v34 = vsel %vm803_vm5, %v1624_v32, 0 }
 0x870   : > { %v1674_v58 = vpop.permute.xlu1 %1673 }
 0x871   : > { %v1679_v0 = vsel %vm803_vm5, %v1674_v58, 0 }
 0x873   : > { %v2631_v21 = vpop.eup %2630 }
 0x874   : > { %v1465_v22 = vsel %vm803_vm5, %v2631_v21, 0.0  ;;  %v1672_v2 = vpop.permute.xlu1 %1671 }
 0x896   : > { %v1292_v6 = vpop.f32.mrb[24].mxu1 }
 0x897   : > { %v3050_v7 = vadd.f32 %v1339_v50, %v1292_v6  ;;  %v2467_v8 = vpop.f32.mrb[25].mxu1 }
 0x898   : > { %v1295_v9 = vpop.f32.mrb[26].mxu1 }
 0x899   : > { %v3052_v12 = vadd.f32 %v1342_v54, %v1295_v9  ;;  %v2468_v13 = vpop.f32.mrb[27].mxu1 }
 0x89e   : > { %v1390_v14 = vpop.f32.mrb[28].mxu1 }
 0x89f   : > { %v1446_v15 = vmul.f32 0.35355338, %v1390_v14  ;;  %v2479_v16 = vpop.f32.mrb[29].mxu1 }
 0x8a0   : > { %v1393_v17 = vpop.f32.mrb[30].mxu1 }
 0x8a1   : > { %v2480_v18 = vpop.f32.mrb[31].mxu1  ;;  %v1448_v19 = vadd.f32 %v1446_v15, %v2953_v62 }
 0x8a3   : > { %v1450_v20 = vsel %vm803_vm5, %v1448_v19, -inf }
 0x8a4   : > { %1451 = vmax.xlane.f32.xlu0 %v1450_v20 }
 0x8a8   : > { %1466 = vadd.xlane.f32.xlu0 %v1465_v22 }
 0x931   : > { %v1452_v23 = vpop.xlane.xlu0 %1451 }
 0x932   : > { %v1456_v24 = vsub.f32 %v1448_v19, %v1452_v23 }
 0x934   : > { %v1458_v25 = vmul.f32 1.442695, %v1456_v24 }
 0x935   : > { %v1467_v26 = vpop.xlane.xlu0 %1466 }
 0x936   : > { %2632 = vpow2.f32 %v1458_v25 }
 0x937   : > { %2634 = vrcp.f32 %v1467_v26 }
 0x940   : > { %v2633_v28 = vpop.eup %2632 }
 0x941   : > { %v2635_v29 = vpop.eup %2634  ;;  %v1462_v30 = vsel %vm803_vm5, %v2633_v28, 0.0 }
 0x942   : > { %v1471_v31 = vmul.f32 %v2635_v29, %v2631_v21  ;;  %1463 = vadd.xlane.f32.xlu0 %v1462_v30 }
 0x944   : > { %v1473_v33 = vpack.c.bf16 %v1471_v31, %v1471_v31 }
 0x946   : > { %2496 = vmatmul.mubr.msk.bf16.vlgmr.msra.gmra.mrb[20].mxu0 %vm803_vm5, %v1473_v33 }
 0x947   : > { %2506 = vmatpush3.bf16.xpose.msra.mxu0 %v1629_v34  ;;  %2507 = vmatprep.mubr.msk.bf16.mxu0 %vm2714_vm4, %v2713_v27 }
 0x948   : > { %2517 = vmatprep.subr.bf16.mxu0 %v2713_v27 }
 0x958   : > { %1474 = vrot.lane.b32.xlu0 %v2935_v53, %s2722_s27 }
 0x95c   : > { %1621 = vrot.lane.b32.xlu0 %v2935_v53, %s2724_s19 }
 0x9cf   : > { %v1464_v35 = vpop.xlane.xlu0 %1463 }
 0x9d0   : > { %2636 = vrcp.f32 %v1464_v35 }
 0x9d3   : > { %v1475_v36 = vpop.permute.xlu0 %1474 }
 0x9d4   : > { %v1480_v37 = vsel %vm932_vm6, %v1475_v36, 0 }
 0x9d5   : > { %2488 = vmatpush3.bf16.msra.mxu1 %v1480_v37 }
 0x9d6   : > { %2499 = vmatprep.subr.bf16.mxu1 %v2713_v27 }
 0x9d7   : > { %v1622_v38 = vpop.permute.xlu0 %1621 }
 0x9d8   : > { %2508 = vmatmul.mubr.msk.bf16.vlgmr.msra.gmra.mrb[24].mxu0 %vm803_vm5, %v1622_v38  ;;  %v797_v38 = vld [vmem:[%s3261_s23 + $0x18] sm:$0xff] }
 0x9d9   : > { %2519 = vmatprep.mubr.msk.bf16.mxu0 %vm2714_vm4, %v2713_v27 }
 0x9da   : > { %v2637_v39 = vpop.eup %2636 }
 0x9db   : > { %v1470_v40 = vmul.f32 %v2637_v39, %v2633_v28  ;;  %v1846_v39 = vpack.c.bf16 %v797_v38, %v797_v38 }
 0x9dd   : > { %v1472_v41 = vpack.c.bf16 %v1470_v40, %v1470_v40  ;;  %v1851_v40 = vsel %vm932_vm6, %v1846_v39, 0  ;;  %v2030_v39 = vld [vmem:[%s2877_s22 + $0x20] sm:$0xff] }
 0x9df   : > { %2490 = vmatmul.mubr.msk.bf16.vlgmr.msra.gmra.mrb[32].mxu1 %vm803_vm5, %v1472_v41 }
 0x9e0   : > { %2501 = vmatprep.mubr.msk.bf16.mxu1 %vm2714_vm4, %v2713_v27  ;;  %2500 = vmatpush3.bf16.msra.mxu1 %v1576_v48 }
 0x9e1   : > { %2511 = vmatprep.subr.bf16.mxu1 %v2713_v27 }
 0xa19   : > { %v1564_v42 = vpop.f32.mrb[20].mxu0 }
 0xa1a   : > { %v2497_v43 = vpop.f32.mrb[21].mxu0 }
 0xa1b   : > { %v1567_v44 = vpop.f32.mrb[22].mxu0 }
 0xa1c   : > { %v2498_v45 = vpop.f32.mrb[23].mxu0 }
 0xaab   : > { %v1665_v49 = vpop.f32.mrb[24].mxu0 }
 0xaac   : > { %v1721_v50 = vmul.f32 0.35355338, %v1665_v49  ;;  %v2509_v51 = vpop.f32.mrb[25].mxu0 }
 0xaad   : > { %v1668_v52 = vpop.f32.mrb[26].mxu0 }
 0xaae   : > { %v2510_v54 = vpop.f32.mrb[27].mxu0  ;;  %v1723_v55 = vadd.f32 %v1721_v50, %v2953_v62 }
 0xaaf   : > { %v2335_v54 = vld [vmem:[%s3262_s14] ss:$0 sm:$0xff] }
 0xab0   : > { %v1725_v57 = vsel %vm803_vm5, %v1723_v55, -inf }
 0xab1   : > { %1726 = vmax.xlane.f32.xlu0 %v1725_v57 }
 0xab2   : > { %v1516_v59 = vpop.f32.mrb[32].mxu1 }
 0xab3   : > { %v1570_v60 = vpack.c.bf16 %v1564_v42, %v1516_v59  ;;  %v2491_v61 = vpop.f32.mrb[33].mxu1 }
 0xab4   : > { %v1519_v63 = vpop.f32.mrb[34].mxu1 }
 0xab5   : > { %v2492_v1 = vpop.f32.mrb[35].mxu1  ;;  %2502 = vmatmul.mubr.msk.bf16.vlgmr.msra.gmra.mrb[36].mxu1 %vm803_vm5, %v1570_v60 }
 0xab6   : > { %2512 = vmatpush3.bf16.xpose.msra.mxu1 %v1679_v0  ;;  %2513 = vmatprep.mubr.msk.bf16.mxu1 %vm2714_vm4, %v2713_v27 }
 0xab7   : > { %2523 = vmatprep.subr.bf16.mxu1 %v2713_v27 }
 0xabd   : > { %2514 = vmatmul.mubr.msk.bf16.vlgmr.msra.gmra.mrb[40].mxu1 %vm803_vm5, %v1672_v2 }
 0xabe   : > { %2525 = vmatprep.mubr.msk.bf16.mxu1 %vm2714_vm4, %v2713_v27 }
 0xb3e   : > { %v1727_v3 = vpop.xlane.xlu0 %1726 }
 0xb3f   : > { %v1731_v4 = vsub.f32 %v1723_v55, %v1727_v3 }
 0xb41   : > { %v1733_v5 = vmul.f32 1.442695, %v1731_v4 }
 0xb43   : > { %2638 = vpow2.f32 %v1733_v5 }
 0xb4d   : > { %v2639_v6 = vpop.eup %2638 }
 0xb4e   : > { %v1737_v8 = vsel %vm803_vm5, %v2639_v6, 0.0 }
 0xb4f   : > { %1738 = vadd.xlane.f32.xlu0 %v1737_v8 }
 0xb88   : > { %v1612_v9 = vpop.f32.mrb[36].mxu1 }
 0xb89   : > { %v1619_v13 = vadd.f32 %v1612_v9, %v3050_v7  ;;  %v2503_v14 = vpop.f32.mrb[37].mxu1 }
 0xb8a   : > { %v1615_v15 = vpop.f32.mrb[38].mxu1  ;;  %v1952_v14 = vld [vmem:[%s2867_s4] sm:$0xff] }
 0xb8b   : > { %v3091_v16 = vadd.f32 %v1615_v15, %v3052_v12  ;;  %v2504_v17 = vpop.f32.mrb[39].mxu1  ;;  %v1953_v15 = vld [vmem:[%s2867_s4 + $0x8] sm:$0xff] }
 0xb8c   : > { %v1954_v17 = vld [vmem:[%s2867_s4 + $0x10] sm:$0xff] }
 0xb90   : > { %v1715_v18 = vpop.f32.mrb[40].mxu1 }
 0xb91   : > { %v1722_v19 = vmul.f32 0.35355338, %v1715_v18  ;;  %v2515_v20 = vpop.f32.mrb[41].mxu1  ;;  %v1955_v18 = vld [vmem:[%s2867_s4 + $0x18] sm:$0xff] }
 0xb92   : > { %v1718_v21 = vpop.f32.mrb[42].mxu1 }
 0xb93   : > { %v2516_v22 = vpop.f32.mrb[43].mxu1  ;;  %v1724_v23 = vadd.f32 %v1722_v19, %v2953_v62  ;;  %v1957_v19 = vpack.c.bf16 %v1955_v18, %v1954_v17 }
 0xb95   : > { %v1728_v24 = vsel %vm803_vm5, %v1724_v23, -inf }
 0xb96   : > { %1729 = vmax.xlane.f32.xlu1 %v1728_v24 }
 0xba7   : > { %1797 = vrot.lane.b32.xlu1 %v2937_v56, %s2725_s20 }
 0xbdc   : > { %v1739_v62 = vpop.xlane.xlu0 %1738 }
 0xc23   : > { %v1730_v7 = vpop.xlane.xlu1 %1729 }
 0xc24   : > { %v1732_v25 = vsub.f32 %v1724_v23, %v1730_v7 }
 0xc26   : > { %v1735_v26 = vmul.f32 1.442695, %v1732_v25 }
 0xc27   : > { %v1798_v28 = vpop.permute.xlu1 %1797 }
 0xc28   : > { %2640 = vpow2.f32 %v1735_v26  ;;  %v1803_v12 = vsel %vm932_vm6, %v1798_v28, 0  ;;  %v2336_v26 = vld [vmem:[%s645_s3] ss:$0 sm:$0xff] }
 0xc29   : > { %2524 = vmatpush3.bf16.msra.mxu1 %v1803_v12  ;;  %2642 = vrcp.f32 %v1739_v62  ;;  %v2337_v62 = vld [vmem:[%s648_s28] ss:$0 sm:$0xff] }
 0xc2a   : > { %2535 = vmatprep.subr.bf16.mxu1 %v2713_v27 }
 0xc32   : > { %v2641_v29 = vpop.eup %2640 }
 0xc33   : > { %v1740_v30 = vsel %vm803_vm5, %v2641_v29, 0.0  ;;  %v2643_v31 = vpop.eup %2642 }
 0xc34   : > { %1741 = vadd.xlane.f32.xlu0 %v1740_v30  ;;  %v1745_v32 = vmul.f32 %v2643_v31, %v2639_v6 }
 0xc36   : > { %v1747_v35 = vpack.c.bf16 %v1745_v32, %v1745_v32 }
 0xc4a   : > { %1749 = vrot.lane.b32.xlu0 %v2935_v53, %s2725_s20 }
 0xcc1   : > { %v1742_v56 = vpop.xlane.xlu0 %1741 }
 0xcc2   : > { %2644 = vrcp.f32 %v1742_v56 }
 0xcc5   : > { %v1750_v33 = vpop.permute.xlu0 %1749 }
 0xcc6   : > { %v1755_v34 = vsel %vm932_vm6, %v1750_v33, 0 }
 0xcc7   : > { %2518 = vmatpush3.bf16.msra.mxu0 %v1755_v34  ;;  %v2026_v34 = vld [vmem:[%s2877_s22] sm:$0xff] }
 0xcc8   : > { %2529 = vmatprep.subr.bf16.mxu0 %v2713_v27 }
 0xcca   : > { %2520 = vmatmul.mubr.msk.bf16.vlgmr.msra.gmra.mrb[28].mxu0 %vm803_vm5, %v1747_v35  ;;  %v2027_v35 = vld [vmem:[%s2877_s22 + $0x8] sm:$0xff] }
 0xccb   : > { %2531 = vmatprep.mubr.msk.bf16.mxu0 %vm2714_vm4, %v2713_v27  ;;  %2530 = vmatpush3.bf16.msra.mxu0 %v1851_v40  ;;  %v2031_v40 = vld [vmem:[%s2877_s22 + $0x28] sm:$0xff] }
 0xccc   : > { %v2645_v53 = vpop.eup %2644  ;;  %2543 = vmatprep.subr.bf16.mxu0 %v2713_v27 }
 0xccd   : > { %v1746_v36 = vmul.f32 %v2645_v53, %v2641_v29  ;;  %v2042_v53 = vpack.c.bf16 %v2027_v35, %v2026_v34 }
 0xccf   : > { %v1748_v37 = vpack.c.bf16 %v1746_v36, %v1746_v36  ;;  %v2028_v36 = vld [vmem:[%s2877_s22 + $0x10] sm:$0xff] }
 0xcd1   : > { %2526 = vmatmul.mubr.msk.bf16.vlgmr.msra.gmra.mrb[44].mxu1 %vm803_vm5, %v1748_v37  ;;  %v2029_v37 = vld [vmem:[%s2877_s22 + $0x18] sm:$0xff] }
 0xcd2   : > { %2539 = vmatprep.mubr.msk.bf16.mxu1 %vm2714_vm4, %v2713_v27  ;;  %v2043_v38 = vpack.c.bf16 %v2029_v37, %v2028_v36 }
 0xd9d   : > { %v1791_v41 = vpop.f32.mrb[28].mxu0 }
 0xd9e   : > { %v2521_v42 = vpop.f32.mrb[29].mxu0 }
 0xd9f   : > { %v1794_v43 = vpop.f32.mrb[30].mxu0  ;;  %v2032_v42 = vld [vmem:[%s2877_s22 + $0x30] sm:$0xff] }
 0xda0   : > { %v2522_v44 = vpop.f32.mrb[31].mxu0  ;;  %v2033_v43 = vld [vmem:[%s2877_s22 + $0x38] sm:$0xff] }
 0xda1   : > { %v2045_v44 = vpack.c.bf16 %v2033_v43, %v2032_v42 }
 0xda4   : > { %v1839_v45 = vpop.f32.mrb[44].mxu1 }
 0xda5   : > { %v1845_v46 = vpack.c.bf16 %v1839_v45, %v1791_v41  ;;  %v2527_v47 = vpop.f32.mrb[45].mxu1  ;;  %v2044_v41 = vpack.c.bf16 %v2031_v40, %v2030_v39  ;;  %v2034_v45 = vld [vmem:[%s2877_s22 + $0x40] sm:$0xff] }
 0xda6   : > { %v1842_v48 = vpop.f32.mrb[46].mxu1 }
 0xda7   : > { %v2528_v49 = vpop.f32.mrb[47].mxu1  ;;  %2532 = vmatmul.mubr.msk.bf16.vlgmr.msra.gmra.mrb[32].mxu0 %vm803_vm5, %v1845_v46  ;;  %v2035_v46 = vld [vmem:[%s2877_s22 + $0x48] sm:$0xff]  ;;  %v2036_v48 = vld [vmem:[%s2877_s22 + $0x50] sm:$0xff] }
 0xda8   : > { %2559 = vmatprep.mubr.msk.bf16.mxu0 %vm2714_vm4, %v2713_v27  ;;  %2544 = vmatpush3.bf16.msra.mxu0 %v2042_v53  ;;  %v2046_v47 = vpack.c.bf16 %v2035_v46, %v2034_v45  ;;  %v2037_v49 = vld [vmem:[%s2877_s22 + $0x58] sm:$0xff] }
 0xda9   : > { %2545 = vmatprep.subr.bf16.mxu0 %v2713_v27 }
 0xdac   : > { %2546 = vmatpush3.bf16.msra.mxu0 %v2043_v38 }
 0xdad   : > { %2547 = vmatprep.subr.bf16.mxu0 %v2713_v27 }
 0xdb0   : > { %2548 = vmatpush3.bf16.msra.mxu0 %v2044_v41 }
 0xdb1   : > { %2549 = vmatprep.subr.bf16.mxu0 %v2713_v27 }
 0xdb4   : > { %2550 = vmatpush3.bf16.msra.mxu0 %v2045_v44 }
 0xdb5   : > { %2551 = vmatprep.subr.bf16.mxu0 %v2713_v27 }
 0xdb8   : > { %2552 = vmatpush3.bf16.msra.mxu0 %v2046_v47 }
 0xdb9   : > { %2553 = vmatprep.subr.bf16.mxu0 %v2713_v27 }
 0xe7a   : > { %v1887_v50 = vpop.f32.mrb[32].mxu0 }
 0xe7b   : > { %v1894_v51 = vadd.f32 %v1887_v50, %v1619_v13  ;;  %v2533_v52 = vpop.f32.mrb[33].mxu0  ;;  %v2047_v50 = vpack.c.bf16 %v2037_v49, %v2036_v48 }
 0xe7c   : > { %v1890_v55 = vpop.f32.mrb[34].mxu0  ;;  %v2039_v52 = vld [vmem:[%s2877_s22 + $0x68] sm:$0xff] }
 0xe7d   : > { %v1896_v57 = vadd.f32 %v1894_v51, %v2893_v10  ;;  %v1895_v58 = vadd.f32 %v1890_v55, %v3091_v16  ;;  %v2534_v59 = vpop.f32.mrb[35].mxu0  ;;  %v1956_v16 = vpack.c.bf16 %v1953_v15, %v1952_v14  ;;  %2554 = vmatpush3.bf16.msra.mxu0 %v2047_v50  ;;  %v2038_v51 = vld [vmem:[%s2877_s22 + $0x60] sm:$0xff]  ;;  %v2040_v55 = vld [vmem:[%s2877_s22 + $0x70] sm:$0xff] }
 0xe7e   : > { %2555 = vmatprep.subr.bf16.mxu0 %v2713_v27  ;;  %v2338_v59 = vld [vmem:[%s656_s6] ss:$0 sm:$0xff] }
 0xe7f   : > { %v3121_v60 = vadd.f32 %v2335_v54, %v1896_v57  ;;  %v1897_v61 = vadd.f32 %v1895_v58, %v2895_v11  ;;  %2536 = vmatpush3.bf16.msra.mxu1 %v1956_v16  ;;  %v2041_v57 = vld [vmem:[%s2877_s22 + $0x78] sm:$0xff] }
 0xe80   : > { %2537 = vmatprep.subr.bf16.mxu1 %v2713_v27  ;;  %v2049_v58 = vpack.c.bf16 %v2041_v57, %v2040_v55 }
 0xe81   : > { %v3124_v63 = vadd.f32 %v2335_v54, %v1897_v61  ;;  %v1909_v0 = vsel %vm692_vm3, %v3121_v60, 0.0  ;;  %v2048_v54 = vpack.c.bf16 %v2039_v52, %v2038_v51 }
 0xe82   : > { %1910 = vadd.xlane.f32.xlu1 %v1909_v0 }
 0xe83   : > { %v1912_v1 = vsel %vm692_vm3, %v3124_v63, 0.0  ;;  %2538 = vmatpush3.bf16.msra.mxu1 %v1957_v19  ;;  %2556 = vmatpush3.bf16.msra.mxu0 %v2048_v54 }
 0xe84   : > { %1913 = vadd.xlane.f32.xlu0 %v1912_v1  ;;  %2557 = vmatprep.subr.bf16.mxu0 %v2713_v27 }
 0xe87   : > { %2558 = vmatpush3.bf16.msra.mxu0 %v2049_v58 }
 0xf0f   : > { %v1911_v10 = vpop.xlane.xlu1 %1910 }
 0xf10   : > { %v1915_v2 = vmul.f32 0.03125, %v1911_v10 }
 0xf11   : > { %v1914_v3 = vpop.xlane.xlu0 %1913 }
 0xf12   : > { %v1917_v4 = vsub.f32 %v3121_v60, %v1915_v2  ;;  %v1916_v11 = vmul.f32 0.03125, %v1914_v3 }
 0xf14   : > { %v1918_v5 = vsub.f32 %v3124_v63, %v1916_v11  ;;  %v1919_v6 = vmul.f32 %v1917_v4, %v1917_v4 }
 0xf16   : > { %v1921_v8 = vsel %vm692_vm3, %v1919_v6, 0.0  ;;  %v1920_v9 = vmul.f32 %v1918_v5, %v1918_v5 }
 0xf17   : > { %1922 = vadd.xlane.f32.xlu0 %v1921_v8 }
 0xf18   : > { %v1924_v13 = vsel %vm692_vm3, %v1920_v9, 0.0 }
 0xf19   : > { %1925 = vadd.xlane.f32.xlu1 %v1924_v13 }
 0xfa4   : > { %v1923_v20 = vpop.xlane.xlu0 %1922 }
 0xfa5   : > { %v1927_v21 = vmul.f32 0.03125, %v1923_v20  ;;  %v2342_v20 = vld [vmem:[%s664_s26] ss:$0 sm:$0xff] }
 0xfa6   : > { %v1926_v22 = vpop.xlane.xlu1 %1925 }
 0xfa7   : > { %v1929_v23 = vadd.f32 1e-05, %v1927_v21  ;;  %v1928_v24 = vmul.f32 0.03125, %v1926_v22 }
 0xfa9   : > { %2646 = vrsqrt.f32 %v1929_v23  ;;  %v1930_v7 = vadd.f32 1e-05, %v1928_v24 }
 0xfab   : > { %2648 = vrsqrt.f32 %v1930_v7 }
 0xfb3   : > { %v2647_v25 = vpop.eup %2646 }
 0xfb4   : > { %v1933_v28 = vmul.f32 %v2647_v25, %v1917_v4 }
 0xfb5   : > { %v2649_v12 = vpop.eup %2648 }
 0xfb6   : > { %v1941_v29 = vmul.f32 %v2336_v26, %v1933_v28  ;;  %v1934_v30 = vmul.f32 %v2649_v12, %v1918_v5 }
 0xfb8   : > { %v1942_v31 = vmul.f32 %v2336_v26, %v1934_v30  ;;  %v1949_v56 = vadd.f32 %v2337_v62, %v1941_v29 }
 0xfba   : > { %v1950_v32 = vadd.f32 %v2337_v62, %v1942_v31 }
 0xfbc   : > { %v1951_v33 = vpack.c.bf16 %v1950_v32, %v1949_v56 }
 0xfbe   : > { %2540 = vmatmul.mubr.msk.bf16.vlgmr.msra.gmra.mrb[48].mxu1 %vm692_vm3, %v1951_v33 }
0x1091   : > { %v2002_v61 = vpop.f32.mrb[48].mxu1 }
0x1092   : > { %v2003_v0 = vadd.f32 %v2338_v59, %v2002_v61  ;;  %v2541_v1 = vpop.f32.mrb[49].mxu1 }
0x1093   : > { %v2005_v10 = vpop.f32.mrb[50].mxu1 }
0x1094   : > { %v2340_v2 = vmul.f32 -1.702, %v2003_v0  ;;  %v2006_v3 = vadd.f32 %v2338_v59, %v2005_v10  ;;  %v2542_v4 = vpop.f32.mrb[51].mxu1 }
0x1096   : > { %v2013_v11 = vmul.f32 1.442695, %v2340_v2  ;;  %v2341_v5 = vmul.f32 -1.702, %v2006_v3 }
0x1098   : > { %2650 = vpow2.f32 %v2013_v11  ;;  %v2015_v27 = vmul.f32 1.442695, %v2341_v5 }
0x109a   : > { %2652 = vpow2.f32 %v2015_v27 }
0x10a2   : > { %v2651_v6 = vpop.eup %2650 }
0x10a3   : > { %v2017_v8 = vadd.f32 1.0, %v2651_v6 }
0x10a4   : > { %v2653_v9 = vpop.eup %2652 }
0x10a5   : > { %2654 = vrcp.f32 %v2017_v8  ;;  %v2018_v13 = vadd.f32 1.0, %v2653_v9 }
0x10a7   : > { %2656 = vrcp.f32 %v2018_v13 }
0x10af   : > { %v2655_v14 = vpop.eup %2654 }
0x10b0   : > { %v2023_v16 = vmul.f32 %v2655_v14, %v2003_v0 }
0x10b1   : > { %v2657_v15 = vpop.eup %2656 }
0x10b2   : > { %v2024_v17 = vmul.f32 %v2657_v15, %v2006_v3 }
0x10b4   : > { %v2025_v18 = vpack.c.bf16 %v2024_v17, %v2023_v16 }
0x10b6   : > { %2560 = vmatmul.mubr.bf16.vlgmr.msra.gmra.mrb[36].mxu0 %v2025_v18 }
0x1189   : > { %v2084_v19 = vpop.f32.mrb[36].mxu0 }
0x118a   : > { %v2091_v21 = vadd.f32 %v2084_v19, %v3121_v60  ;;  %v2561_v22 = vpop.f32.mrb[37].mxu0  ;;  %2107 = sbr.rel (%p2343_p6) target bundleno = 4505 (0x1199), region = 84 }
0x118b   : > { %v2087_v23 = vpop.f32.mrb[38].mxu0 }
0x118c   : > { %v2100_v24 = vadd.f32 %v2342_v20, %v2091_v21  ;;  %v2092_v7 = vadd.f32 %v2087_v23, %v3124_v63  ;;  %v2562_v25 = vpop.f32.mrb[39].mxu0 }
0x118e   : > { %2102 = vst.msk [vmem:[#allocation2] sm:$0xff] %vm692_vm3, %v2100_v24  ;;  %v2101_v26 = vadd.f32 %v2342_v20, %v2092_v7 }
0x1190   : > { %2103 = vst.msk [vmem:[#allocation2 + $0x8] sm:$0xff] %vm692_vm3, %v2101_v26 }
0x1195   : > { %v2108_v28 = vld [vmem:[#allocation2] sm:$0xff] }
0x1196   : > { %2110 = vst.msk [vmem:[#allocation4] sm:$0xff] %vm692_vm3, %v2108_v28 }
0x1197   : > { %v2109_v12 = vld [vmem:[#allocation2 + $0x8] sm:$0xff] }
0x1198   : > { %2111 = vst.msk [vmem:[#allocation4 + $0x8] sm:$0xff] %vm692_vm3, %v2109_v12 }
0x1199 PF: > { %s3263_s18 = sld [smem:[#allocation8_spill]]  ;;  %s2726_s23 = smov [#allocation4]  }
0x119a   : > { %s2121_s27 = sshll.u32 %s2726_s23, 4  ;;  %s2122_s27 = int_to_ptr.vmem [resolvable:$true] %s2121_s27 }
0x119b   : > { %s2658_s25 = scalar_lea.vmem %s2122_s27, 256  ;;  %p2665_p11 = scmp.lt.s32.totalorder %s2122_s27, %s2122_s27 }
0x119c   : > { %p2659_p8 = scmp.ne.s32.totalorder %s2122_s27, %s2658_s25  ;;  %p2666_p12 = scmp.lt.s32.totalorder %s2658_s25, %s2658_s25 }
0x119e   : > { %p2667_p13 = por %p2666_p12, %p2665_p11 }
0x119f   : > { %s3264_s26 = sadd.s32 4294967295, %s3263_s18  }
0x11a0   : > { %p3192_p7 = scmp.eq.s32.totalorder %s3264_s26, 1 }
0x11a2   : > { %p2660_p9 = pnand %p2659_p8, %p3192_p7 }
0x11a4   : > { %p2661_p10 = pneg %p2660_p9 }
0x11a6   : > { %p2668_p0 = pnand %p2667_p13, %p2661_p10 }
0x11a8   : > { %2671 = shalt.err (!%p2668_p0)
}
0x11a9   : > { %s3266_s20 = sld [smem:[#allocation14_spill]] }
0x11af   : > { %s2672_s30 = scalar_lea.hbm %s3266_s20, 256 }
0x11b0   : > { %p2673_p1 = scmp.ne.s32.totalorder %s3266_s20, %s2672_s30  ;;  %p2678_p4 = scmp.lt.u32.totalorder %s2672_s30, %s3266_s20 }
0x11b2   : > { %p2674_p2 = pnand %p2673_p1, %p3192_p7 }
0x11b4   : > { %p2675_p3 = pneg %p2674_p2 }
0x11b6   : > { %p2680_p5 = pnand %p2678_p4, %p2675_p3 }
0x11b8   : > { %2683 = shalt.err (!%p2680_p5)
}
0x11b9   : > { %s2727_s4 = smov 128   ;;  %s2728_s21 = smov 8  }
0x11ba   : > { %2564 = dma.vmem_to_hbm [thread:$0]  (%p3192_p7), %s2122_s27, 256, %s3266_s20, [#allocation5], %s2727_s4, %s2727_s4, %s2728_s21  }
0x11bb   : > { %2697 = dma.done.wait (%p3192_p7), [#allocation5], 256  }
0x11bc   : > { %2699 = vsyncadd (%p3192_p7), [#allocation5], 4294967040 }
0x11bd PF: > { %s3267_s6 = sld [smem:[#allocation8_spill]]  ;;  %s3268_s29 = sld [smem:[#allocation7_spill]] }
0x11be   : > { %s3269_s30 = sld [smem:[#allocation9_spill]] }
0x11c3   : > { %s25_s15 = sadd.s32 1, %s3267_s6  }
0x11c4   : > { %p22_p6 = scmp.ge.s32.totalorder %s25_s15, 4  }
0x11c6   :  { %24 = sbr.rel (!%p22_p6) target bundleno = 7 (0x7), region = 148 }
0x11cd   :  { %2137 = vsyncpa [#allocation5], 1 }
0x11ce   :  { %2139 = vsyncpa [#allocation5 + $0x1], 1 }

</bundles_post_ra>
